<compile_context>
chip_gen: v5e
topology: v5e:2x2
jax: 0.10.0
libtpu: 0.0.40
codegen_flags: <defaults>
</compile_context>

<pallas_src>
import math
from functools import partial

import jax
import jax.numpy as jnp
from jax import lax
from jax.experimental import pallas as pl
from jax.experimental.pallas import tpu as pltpu

PACK = 8  # pixels packed along lanes: 8*width = 256 lanes, 8*out_dims = 128 lanes


def _round_up(x, m):
    return ((x + m - 1) // m) * m


def mlp_kernel(x_ref, w1_ref, b1_ref, w2_ref, b2_ref, wout_ref, o_ref, *, depth):
    # x_ref:    (TR, PACK*width)                       packed activations
    # w1_ref:   (depth, PACK*width, PACK*width) bf16   block-diagonal
    # b1_ref:   (depth, 1, PACK*width) f32             pixel-tiled bias
    # w2_ref:   (depth, PACK*width, PACK*width) bf16
    # b2_ref:   (depth, 1, PACK*width) f32
    # wout_ref: (PACK*width, PACK*out_dims) bf16       block-diagonal head
    # o_ref:    (TR, PACK*out_dims)
    h = x_ref[...].astype(jnp.float32)

    # depth is a small static Python int -> fully unrolled, static ref indices.
    for d in range(depth):
        residual = h
        t = jnp.dot(h.astype(jnp.bfloat16), w1_ref[d],
                    preferred_element_type=jnp.float32) + b1_ref[d]
        t = jnp.maximum(t, 0.0)                                   # ReLU
        t = jnp.dot(t.astype(jnp.bfloat16), w2_ref[d],
                    preferred_element_type=jnp.float32) + b2_ref[d]
        h = jnp.maximum(t + residual, 0.0)                        # residual + ReLU

    # final bias-free Linear head; PACK*out_dims = 128 -> unmasked lane-dense stores
    o_ref[...] = jnp.dot(h.astype(jnp.bfloat16), wout_ref[...],
                         preferred_element_type=jnp.float32).astype(o_ref.dtype)


def mlp_forward(x, packed_params, *, tile_px=512):
    """x: (B, P, width) or (N, width); packed_params from pack_params()."""
    w1b, b1b, w2b, b2b, woutb = packed_params
    depth = w1b.shape[0]
    wp = w1b.shape[-1]             # PACK * width
    op = woutb.shape[-1]           # PACK * out_dims
    width = wp // PACK
    out_dims = op // PACK

    orig_shape = x.shape
    x2 = x.reshape(-1, orig_shape[-1]) if x.ndim == 3 else x
    n, feat = x2.shape
    assert feat == width, (feat, width)

    # pixel tile must be a multiple of PACK*8=64 so packed sublanes stay /8-aligned;
    # shrink for tiny inputs, then zero-pad N up to a whole number of tiles.
    tile_px = max(PACK * 8, min(_round_up(tile_px, PACK * 8),
                                _round_up(n, PACK * 8)))
    n_pad = _round_up(n, tile_px)
    if n_pad != n:
        x2 = jnp.pad(x2, ((0, n_pad - n), (0, 0)))

    rows = n_pad // PACK
    tile_rows = tile_px // PACK
    xp = x2.reshape(rows, wp)                       # free row-major repack

    flops = 2 * n_pad * width * (2 * depth * width + out_dims)
    param_bytes = sum(int(p.size) * p.dtype.itemsize
                      for p in (w1b, b1b, w2b, b2b, woutb))
    bytes_accessed = (int(xp.size) * xp.dtype.itemsize
                      + rows * op * xp.dtype.itemsize + param_bytes)

    out_p = pl.pallas_call(
        partial(mlp_kernel, depth=depth),
        out_shape=jax.ShapeDtypeStruct((rows, op), x2.dtype),
        grid_spec=pltpu.PrefetchScalarGridSpec(
            num_scalar_prefetch=0,
            grid=(rows // tile_rows,),
            in_specs=[
                pl.BlockSpec((tile_rows, wp), lambda i: (i, 0)),
                # Weights/biases fully resident (constant index maps -> DMA'd once).
                pl.BlockSpec((depth, wp, wp), lambda i: (0, 0, 0)),
                pl.BlockSpec((depth, 1, wp), lambda i: (0, 0, 0)),
                pl.BlockSpec((depth, wp, wp), lambda i: (0, 0, 0)),
                pl.BlockSpec((depth, 1, wp), lambda i: (0, 0, 0)),
                pl.BlockSpec((wp, op), lambda i: (0, 0)),
            ],
            out_specs=pl.BlockSpec((tile_rows, op), lambda i: (i, 0)),
        ),
        compiler_params=pltpu.CompilerParams(
            dimension_semantics=("parallel",),
            vmem_limit_bytes=32 * 1024 * 1024,
        ),
        cost_estimate=pl.CostEstimate(flops=flops, transcendentals=0,
                                      bytes_accessed=bytes_accessed),
    )(xp, w1b, b1b, w2b, b2b, woutb)

    out = out_p.reshape(n_pad, out_dims)[:n]        # free unpack + drop padding
    if x.ndim == 3:
        out = out.reshape(orig_shape[0], orig_shape[1], out_dims)
    return out


def init_params(key, width, depth, output_dims, dtype=jnp.float32):
    """PyTorch-equivalent parameters in their natural (unpacked) shapes."""
    keys = jax.random.split(key, 4 * depth + 1)
    bound = 1.0 / math.sqrt(width)   # nn.Linear default U(-1/sqrt(fan_in), +)
    w1, b1, w2, b2 = [], [], [], []
    for d in range(depth):
        k1, k2, k3, k4 = keys[4 * d: 4 * d + 4]
        w1.append(jax.random.uniform(k1, (width, width), dtype, -bound, bound).T)
        b1.append(jax.random.uniform(k2, (1, width), dtype, -bound, bound))
        w2.append(jax.random.uniform(k3, (width, width), dtype, -bound, bound).T)
        b2.append(jax.random.uniform(k4, (1, width), dtype, -bound, bound))
    w1t = jnp.stack(w1)              # (depth, width, width)  (in, out) layout
    b1s = jnp.stack(b1)              # (depth, 1, width)
    w2t = jnp.stack(w2)
    b2s = jnp.stack(b2)
    # custom Linear head: trunc_normal(0, std) clipped to +-2*std, bias=False
    fan_avg = 0.5 * (width + output_dims)
    std = math.sqrt(1.0 / fan_avg / 10.0)
    wout = std * jax.random.truncated_normal(keys[-1], -2.0, 2.0,
                                             (output_dims, width), dtype)
    return w1t, b1s, w2t, b2s, wout.T   # wout_t: (width, output_dims)


def pack_params(raw, pack=PACK, weight_dtype=jnp.bfloat16):
    """Build PACK-pixel block-diagonal weights (bf16) and pixel-tiled biases (f32)."""
    w1t, b1, w2t, b2, wout_t = raw

    def bd(w):   # (in, out) -> block-diagonal (pack*in, pack*out)
        i, o = w.shape
        eye = jnp.eye(pack, dtype=w.dtype)
        return jnp.einsum("pq,io->piqo", eye, w).reshape(pack * i, pack * o)

    w1b = jnp.stack([bd(w1t[d]) for d in range(w1t.shape[0])]).astype(weight_dtype)
    w2b = jnp.stack([bd(w2t[d]) for d in range(w2t.shape[0])]).astype(weight_dtype)
    b1b = jnp.tile(b1, (1, 1, pack)).astype(jnp.float32)   # (depth,1,pack*width)
    b2b = jnp.tile(b2, (1, 1, pack)).astype(jnp.float32)
    woutb = bd(wout_t).astype(weight_dtype)                 # (pack*width, pack*out)
    return w1b, b1b, w2b, b2b, woutb


def mlp_reference(x, raw, matmul_dtype=jnp.float32):
    """Pure-JAX reference; matmul_dtype=bfloat16 reproduces the kernel's numerics."""
    w1t, b1, w2t, b2, wout_t = raw
    shp = x.shape
    h = (x.reshape(-1, shp[-1]) if x.ndim == 3 else x).astype(jnp.float32)

    def mm(a, b):
        return jnp.dot(a.astype(matmul_dtype), b.astype(matmul_dtype),
                       preferred_element_type=jnp.float32)

    for d in range(w1t.shape[0]):
        res = h
        t = jnp.maximum(mm(h, w1t[d]) + b1[d], 0.0)
        t = mm(t, w2t[d]) + b2[d]
        h = jnp.maximum(t + res, 0.0)
    out = mm(h, wout_t)
    if x.ndim == 3:
        out = out.reshape(shp[0], shp[1], -1)
    return out


if __name__ == "__main__":
    width, depth, output_dims = 32, 2, 16
    batch, num_pixels = 4, 250      # N=1000 -> padded to 1024 -> grid of 2 tiles

    key = jax.random.PRNGKey(0)
    kx, kp = jax.random.split(key)
    x = jax.random.normal(kx, (batch, num_pixels, width), dtype=jnp.float32)

    raw = init_params(kp, width, depth, output_dims)
    params = pack_params(raw)

    out = jax.block_until_ready(mlp_forward(x, params, tile_px=512))
    assert out.shape == (batch, num_pixels, output_dims)
    assert bool(jnp.all(jnp.isfinite(out)))

    # Exact-numerics check (bf16 matmul operands, f32 accumulate, like the kernel).
    ref_match = mlp_reference(x, raw, matmul_dtype=jnp.bfloat16)
    assert jnp.allclose(out, ref_match, atol=2e-3, rtol=2e-3)

    # Sanity against full-precision reference: bounded relative drift from bf16 operands.
    ref_f32 = mlp_reference(x, raw, matmul_dtype=jnp.float32)
    rel = float(jnp.linalg.norm(out - ref_f32) / (jnp.linalg.norm(ref_f32) + 1e-12))
    assert rel < 5e-2, rel

    print("KERNEL_OK")
</pallas_src>

<mosaic_0001>
module attributes {stable_mosaic.version = 11 : i64} {
  func.func @mlp_kernel(%arg0: i32, %arg1: memref<64x256xf32, #tpu.memory_space<vmem>>, %arg2: memref<2x256x256xbf16, #tpu.memory_space<vmem>>, %arg3: memref<2x1x256xf32, #tpu.memory_space<vmem>>, %arg4: memref<2x256x256xbf16, #tpu.memory_space<vmem>>, %arg5: memref<2x1x256xf32, #tpu.memory_space<vmem>>, %arg6: memref<256x128xbf16, #tpu.memory_space<vmem>>, %arg7: memref<64x128xf32, #tpu.memory_space<vmem>>) attributes {dimension_semantics = [#tpu.dimension_semantics<parallel>], iteration_bounds = array<i64: 2>, scalar_prefetch = 0 : i64, scratch_operands = 0 : i64, tpu.core_type = #tpu.core_type<tc>, window_params = [{transform_indices = @transform_0, window_bounds = array<i64: 64, 256>}, {pipeline_mode = #tpu.pipeline_mode<synchronous>, transform_indices = @transform_1, window_bounds = array<i64: 2, 256, 256>}, {pipeline_mode = #tpu.pipeline_mode<synchronous>, transform_indices = @transform_2, window_bounds = array<i64: 2, 1, 256>}, {pipeline_mode = #tpu.pipeline_mode<synchronous>, transform_indices = @transform_3, window_bounds = array<i64: 2, 256, 256>}, {pipeline_mode = #tpu.pipeline_mode<synchronous>, transform_indices = @transform_4, window_bounds = array<i64: 2, 1, 256>}, {pipeline_mode = #tpu.pipeline_mode<synchronous>, transform_indices = @transform_5, window_bounds = array<i64: 256, 128>}, {transform_indices = @transform_6, window_bounds = array<i64: 64, 128>}]} {
    %c0 = arith.constant 0 : index
    %c0_0 = arith.constant 0 : index
    %0 = vector.load %arg1[%c0, %c0_0] : memref<64x256xf32, #tpu.memory_space<vmem>>, vector<64x256xf32>
    %1 = arith.truncf %0 : vector<64x256xf32> to vector<64x256xbf16>
    %c0_1 = arith.constant 0 : index
    %c0_2 = arith.constant 0 : index
    %c0_3 = arith.constant 0 : index
    %2 = vector.load %arg2[%c0_1, %c0_2, %c0_3] : memref<2x256x256xbf16, #tpu.memory_space<vmem>>, vector<1x256x256xbf16>
    %3 = vector.shape_cast %2 : vector<1x256x256xbf16> to vector<256x256xbf16>
    %cst = arith.constant dense<0.000000e+00> : vector<64x256xf32>
    %4 = tpu.matmul %1, %3, %cst {dimension_numbers = #tpu.dot_dimension_numbers<[1], [0], [0], [1], [0, 0, 1, 1], [], []>} : vector<64x256xbf16>, vector<256x256xbf16>, vector<64x256xf32> -> vector<64x256xf32>
    %c0_4 = arith.constant 0 : index
    %c0_5 = arith.constant 0 : index
    %c0_6 = arith.constant 0 : index
    %5 = vector.load %arg3[%c0_4, %c0_5, %c0_6] : memref<2x1x256xf32, #tpu.memory_space<vmem>>, vector<1x1x256xf32>
    %6 = vector.shape_cast %5 : vector<1x1x256xf32> to vector<1x256xf32>
    %7 = vector.broadcast %6 : vector<1x256xf32> to vector<64x256xf32>
    %8 = arith.addf %4, %7 : vector<64x256xf32>
    %cst_7 = arith.constant 0.000000e+00 : f32
    %9 = vector.broadcast %cst_7 : f32 to vector<64x256xf32>
    %10 = arith.maximumf %8, %9 : vector<64x256xf32>
    %11 = arith.truncf %10 : vector<64x256xf32> to vector<64x256xbf16>
    %c0_8 = arith.constant 0 : index
    %c0_9 = arith.constant 0 : index
    %c0_10 = arith.constant 0 : index
    %12 = vector.load %arg4[%c0_8, %c0_9, %c0_10] : memref<2x256x256xbf16, #tpu.memory_space<vmem>>, vector<1x256x256xbf16>
    %13 = vector.shape_cast %12 : vector<1x256x256xbf16> to vector<256x256xbf16>
    %cst_11 = arith.constant dense<0.000000e+00> : vector<64x256xf32>
    %14 = tpu.matmul %11, %13, %cst_11 {dimension_numbers = #tpu.dot_dimension_numbers<[1], [0], [0], [1], [0, 0, 1, 1], [], []>} : vector<64x256xbf16>, vector<256x256xbf16>, vector<64x256xf32> -> vector<64x256xf32>
    %c0_12 = arith.constant 0 : index
    %c0_13 = arith.constant 0 : index
    %c0_14 = arith.constant 0 : index
    %15 = vector.load %arg5[%c0_12, %c0_13, %c0_14] : memref<2x1x256xf32, #tpu.memory_space<vmem>>, vector<1x1x256xf32>
    %16 = vector.shape_cast %15 : vector<1x1x256xf32> to vector<1x256xf32>
    %17 = vector.broadcast %16 : vector<1x256xf32> to vector<64x256xf32>
    %18 = arith.addf %14, %17 : vector<64x256xf32>
    %19 = arith.addf %18, %0 : vector<64x256xf32>
    %cst_15 = arith.constant 0.000000e+00 : f32
    %20 = vector.broadcast %cst_15 : f32 to vector<64x256xf32>
    %21 = arith.maximumf %19, %20 : vector<64x256xf32>
    %22 = arith.truncf %21 : vector<64x256xf32> to vector<64x256xbf16>
    %c1 = arith.constant 1 : index
    %c0_16 = arith.constant 0 : index
    %c0_17 = arith.constant 0 : index
    %23 = vector.load %arg2[%c1, %c0_16, %c0_17] : memref<2x256x256xbf16, #tpu.memory_space<vmem>>, vector<1x256x256xbf16>
    %24 = vector.shape_cast %23 : vector<1x256x256xbf16> to vector<256x256xbf16>
    %cst_18 = arith.constant dense<0.000000e+00> : vector<64x256xf32>
    %25 = tpu.matmul %22, %24, %cst_18 {dimension_numbers = #tpu.dot_dimension_numbers<[1], [0], [0], [1], [0, 0, 1, 1], [], []>} : vector<64x256xbf16>, vector<256x256xbf16>, vector<64x256xf32> -> vector<64x256xf32>
    %c1_19 = arith.constant 1 : index
    %c0_20 = arith.constant 0 : index
    %c0_21 = arith.constant 0 : index
    %26 = vector.load %arg3[%c1_19, %c0_20, %c0_21] : memref<2x1x256xf32, #tpu.memory_space<vmem>>, vector<1x1x256xf32>
    %27 = vector.shape_cast %26 : vector<1x1x256xf32> to vector<1x256xf32>
    %28 = vector.broadcast %27 : vector<1x256xf32> to vector<64x256xf32>
    %29 = arith.addf %25, %28 : vector<64x256xf32>
    %cst_22 = arith.constant 0.000000e+00 : f32
    %30 = vector.broadcast %cst_22 : f32 to vector<64x256xf32>
    %31 = arith.maximumf %29, %30 : vector<64x256xf32>
    %32 = arith.truncf %31 : vector<64x256xf32> to vector<64x256xbf16>
    %c1_23 = arith.constant 1 : index
    %c0_24 = arith.constant 0 : index
    %c0_25 = arith.constant 0 : index
    %33 = vector.load %arg4[%c1_23, %c0_24, %c0_25] : memref<2x256x256xbf16, #tpu.memory_space<vmem>>, vector<1x256x256xbf16>
    %34 = vector.shape_cast %33 : vector<1x256x256xbf16> to vector<256x256xbf16>
    %cst_26 = arith.constant dense<0.000000e+00> : vector<64x256xf32>
    %35 = tpu.matmul %32, %34, %cst_26 {dimension_numbers = #tpu.dot_dimension_numbers<[1], [0], [0], [1], [0, 0, 1, 1], [], []>} : vector<64x256xbf16>, vector<256x256xbf16>, vector<64x256xf32> -> vector<64x256xf32>
    %c1_27 = arith.constant 1 : index
    %c0_28 = arith.constant 0 : index
    %c0_29 = arith.constant 0 : index
    %36 = vector.load %arg5[%c1_27, %c0_28, %c0_29] : memref<2x1x256xf32, #tpu.memory_space<vmem>>, vector<1x1x256xf32>
    %37 = vector.shape_cast %36 : vector<1x1x256xf32> to vector<1x256xf32>
    %38 = vector.broadcast %37 : vector<1x256xf32> to vector<64x256xf32>
    %39 = arith.addf %35, %38 : vector<64x256xf32>
    %40 = arith.addf %39, %21 : vector<64x256xf32>
    %cst_30 = arith.constant 0.000000e+00 : f32
    %41 = vector.broadcast %cst_30 : f32 to vector<64x256xf32>
    %42 = arith.maximumf %40, %41 : vector<64x256xf32>
    %43 = arith.truncf %42 : vector<64x256xf32> to vector<64x256xbf16>
    %c0_31 = arith.constant 0 : index
    %c0_32 = arith.constant 0 : index
    %44 = vector.load %arg6[%c0_31, %c0_32] : memref<256x128xbf16, #tpu.memory_space<vmem>>, vector<256x128xbf16>
    %cst_33 = arith.constant dense<0.000000e+00> : vector<64x128xf32>
    %45 = tpu.matmul %43, %44, %cst_33 {dimension_numbers = #tpu.dot_dimension_numbers<[1], [0], [0], [1], [0, 0, 1, 1], [], []>} : vector<64x256xbf16>, vector<256x128xbf16>, vector<64x128xf32> -> vector<64x128xf32>
    %c0_34 = arith.constant 0 : index
    %c0_35 = arith.constant 0 : index
    %46 = vector.load %arg7[%c0_34, %c0_35] : memref<64x128xf32, #tpu.memory_space<vmem>>, vector<64x128xf32>
    tpu.vector_store %arg7[%c0_34, %c0_35], %45 {strides = array<i32>} : memref<64x128xf32, #tpu.memory_space<vmem>>, vector<64x128xf32>,
    return
  }
  func.func @transform_0(%arg0: i32) -> (i32, i32) {
    %c0_i32 = arith.constant 0 : i32
    %c0_i32_0 = arith.constant 0 : i32
    return %arg0, %c0_i32 : i32, i32
  }
  func.func @transform_1(%arg0: i32) -> (i32, i32, i32) {
    %c0_i32 = arith.constant 0 : i32
    %c0_i32_0 = arith.constant 0 : i32
    %c0_i32_1 = arith.constant 0 : i32
    %c0_i32_2 = arith.constant 0 : i32
    return %c0_i32, %c0_i32_0, %c0_i32_1 : i32, i32, i32
  }
  func.func @transform_2(%arg0: i32) -> (i32, i32, i32) {
    %c0_i32 = arith.constant 0 : i32
    %c0_i32_0 = arith.constant 0 : i32
    %c0_i32_1 = arith.constant 0 : i32
    %c0_i32_2 = arith.constant 0 : i32
    return %c0_i32, %c0_i32_0, %c0_i32_1 : i32, i32, i32
  }
  func.func @transform_3(%arg0: i32) -> (i32, i32, i32) {
    %c0_i32 = arith.constant 0 : i32
    %c0_i32_0 = arith.constant 0 : i32
    %c0_i32_1 = arith.constant 0 : i32
    %c0_i32_2 = arith.constant 0 : i32
    return %c0_i32, %c0_i32_0, %c0_i32_1 : i32, i32, i32
  }
  func.func @transform_4(%arg0: i32) -> (i32, i32, i32) {
    %c0_i32 = arith.constant 0 : i32
    %c0_i32_0 = arith.constant 0 : i32
    %c0_i32_1 = arith.constant 0 : i32
    %c0_i32_2 = arith.constant 0 : i32
    return %c0_i32, %c0_i32_0, %c0_i32_1 : i32, i32, i32
  }
  func.func @transform_5(%arg0: i32) -> (i32, i32) {
    %c0_i32 = arith.constant 0 : i32
    %c0_i32_0 = arith.constant 0 : i32
    %c0_i32_1 = arith.constant 0 : i32
    return %c0_i32, %c0_i32_0 : i32, i32
  }
  func.func @transform_6(%arg0: i32) -> (i32, i32) {
    %c0_i32 = arith.constant 0 : i32
    %c0_i32_0 = arith.constant 0 : i32
    return %arg0, %c0_i32 : i32, i32
  }
}

</mosaic_0001>

<bundles_post_ra>
// kernel: tpu_custom_call.1
= control target key start
LH: loop header
LB: loop body
LE: loop exit
PB: predicated region body
PF: predicated region fallthrough
CT: control target
= control target key end

     0   :  { %s3756_s0 = inlined_call_operand.hbm [shape: f32[128,256], index: 0, kind: input, shape index: {}]   ;;  %s3757_s1 = inlined_call_operand.hbm [shape: bf16[2,256,256], index: 1, kind: input, shape index: {}]   ;;  %s3758_s2 = inlined_call_operand.hbm [shape: f32[2,1,256], index: 2, kind: input, shape index: {}]   ;;  %s3759_s3 = inlined_call_operand.hbm [shape: bf16[2,256,256], index: 3, kind: input, shape index: {}]   ;;  %s3760_s4 = inlined_call_operand.hbm [shape: f32[2,1,256], index: 4, kind: input, shape index: {}]   ;;  %s3761_s5 = inlined_call_operand.hbm [shape: bf16[256,128], index: 5, kind: input, shape index: {}]   ;;  %s3762_s6 = inlined_call_operand.hbm [shape: f32[128,128], index: 6, kind: output, shape index: {}]  }
   0x1   :  { %3763 = sst [smem:[#allocation19_spill]] %s3757_s1 }
   0x2   :  { %11 = vsyncpa [#allocation3], 0 }
   0x3   :  { %13 = vsyncpa [#allocation3 + $0x1], 0 }
   0x4   :  { %14 = vsyncpa [#allocation6], 0 }
   0x5   :  { %15 = vsyncpa [#allocation9], 0 }
   0x6   :  { %16 = vsyncpa [#allocation12], 0 }
   0x7   :  { %17 = vsyncpa [#allocation4], 0 }
   0x8   :  { %19 = vsyncpa [#allocation4 + $0x1], 0  ;;  %s3290_s21 = smov 0   ;;  %s3292_s22 = smov 0  }
   0x9   :  { %s3294_s23 = smov 0   ;;  %s3296_s24 = smov 0  }
   0xa LB: > { %s3764_s1 = sld [smem:[#allocation19_spill]]  ;;  %s3314_s28 = sadd.s32 4294967295, %s3238_s24   ;;  %s3238_s24 = sphi %s3296_s24, %s3776_s24   ;;  %s3234_s23 = sphi %s3294_s23, %s3775_s23   ;;  %s3230_s22 = sphi %s3292_s22, %s3774_s22   ;;  %s3226_s21 = sphi %s3290_s21, %s3773_s21  }
   0xb   : > { %p2102_p0 = scmp.ge.s32.totalorder %s3238_s24, 1  ;;  %p46_p1 = scmp.eq.s32.totalorder %s3314_s28, 0 }
   0xc   : > { %p187_p2 = scmp.lt.s32.totalorder %s3238_s24, 3  ;;  %s3240_s30 = smov [#allocation5]  }
   0xd   : > { %s200_s7 = sshll.u32 %s3240_s30, 4  ;;  %s226_s10 = sshll.u32 %s3759_s3, 4  ;;  %s201_s7 = int_to_ptr.vmem [resolvable:$true] %s200_s7  ;;  %s227_s10 = int_to_ptr.hbm [resolvable:$true] %s226_s10 }
   0xe   : > { %p3319_p3 = pnand %p2102_p0, %p187_p2  ;;  %s212_s14 = sshll.u32 %s3758_s2, 4  ;;  %s213_s14 = int_to_ptr.hbm [resolvable:$true] %s212_s14 }
   0xf   : > { %s3241_s15 = smov [#allocation8]   ;;  %s3242_s17 = smov 128  }
  0x10   : > { %s198_s27 = sshll.u32 %s3764_s1, 4  ;;  %p2889_p4 = pneg %p3319_p3  ;;  %s199_s27 = int_to_ptr.hbm [resolvable:$true] %s198_s27 }
  0x11   : > { %s228_s16 = sshll.u32 %s3241_s15, 4  ;;  %s3243_s18 = smov 8   ;;  %s229_s16 = int_to_ptr.vmem [resolvable:$true] %s228_s16 }
  0x12   : > { %p3331_p6 = pnand %p2889_p4, %p46_p1  ;;  %s3244_s19 = smov [#allocation7]  }
  0x13   : > { %s214_s20 = sshll.u32 %s3244_s19, 4  ;;  %s240_s30 = sshll.u32 %s3760_s4, 4  ;;  %s215_s20 = int_to_ptr.vmem [resolvable:$true] %s214_s20  ;;  %s241_s30 = int_to_ptr.hbm [resolvable:$true] %s240_s30 }
  0x14   : > { %2892 = dma.hbm_to_vmem [thread:$0]  (!%p3331_p6), %s199_s27, 8192, %s201_s7, [#allocation6], %s3242_s17, %s3242_s17, %s3243_s18  }
  0x15   : > { %2898 = dma.hbm_to_vmem [thread:$0]  (!%p3331_p6), %s227_s10, 8192, %s229_s16, [#allocation9], %s3242_s17, %s3242_s17, %s3243_s18  }
  0x16   : > { %s3245_s8 = smov 32   ;;  %s3246_s9 = smov 2  }
  0x17   : > { %2895 = dma.hbm_to_vmem [thread:$0]  (!%p3331_p6), %s213_s14, 64, %s215_s20, [#allocation6], %s3245_s8, %s3245_s8, %s3246_s9  }
  0x18   : > { %s3247_s27 = smov [#allocation10]   ;;  %s254_s13 = sshll.u32 %s3761_s5, 4  ;;  %s255_s13 = int_to_ptr.hbm [resolvable:$true] %s254_s13 }
  0x19   : > { %s242_s7 = sshll.u32 %s3247_s27, 4  ;;  %s3248_s14 = smov [#allocation11]   ;;  %s243_s7 = int_to_ptr.vmem [resolvable:$true] %s242_s7 }
  0x1a   : > { %2901 = dma.hbm_to_vmem [thread:$0]  (!%p3331_p6), %s241_s30, 64, %s243_s7, [#allocation9], %s3245_s8, %s3245_s8, %s3246_s9  }
  0x1b   : > { %s256_s15 = sshll.u32 %s3248_s14, 4  ;;  %s3249_s16 = smov 64   ;;  %s257_s15 = int_to_ptr.vmem [resolvable:$true] %s256_s15 }
  0x1c   : > { %s3250_s17 = smov 4   ;;  %s2101_s18 = sadd.s32 4294967294, %s3238_s24  }
  0x1d   : > { %2904 = dma.hbm_to_vmem [thread:$0]  (!%p3331_p6), %s255_s13, 2048, %s257_s15, [#allocation12], %s3249_s16, %s3249_s16, %s3250_s17  }
  0x1e   : > { %s3356_s19 = sadd.s32 1, %s3238_s24   ;;  %s32_s20 = sadd.s32 1, %s3234_s23 }
  0x1f   : > { %s29_s25 = ssub.s32 %s3238_s24, %s3356_s19  ;;  %p39_p7 = scmp.ne.s32.totalorder %s3234_s23, %s3230_s22 }
  0x20   : > { %p30_p8 = scmp.eq.s32.totalorder %s29_s25, 0  ;;  %p40_p9 = scmp.eq.s32.totalorder %s3238_s24, 0 }
  0x21   : > { %p45_p10 = scmp.ne.s32.totalorder %s3230_s22, %s3226_s21  ;;  %p174_p11 = scmp.eq.s32.totalorder %s3314_s28, 1 }
  0x22   : > { %s3368_s26 = scalar_select %p30_p8, %s3234_s23, %s32_s20  }
  0x23   : > { %p3370_p12 = por %p40_p9, %p39_p7  ;;  %p3376_p13 = por %p46_p1, %p45_p10 }
  0x24   : > { %p3380_p0 = por %p174_p11, %p39_p7  ;;  %p180_p2 = scmp.eq.s32.totalorder %s2101_s18, 1 }
  0x25   : > { %p2918_p4 = scmp.lt.s32.totalorder %s3238_s24, 2  ;;  %s270_s9 = sand.u32 1, %s3234_s23  }
  0x26   : > { %p3386_p6 = por %p180_p2, %p45_p10  ;;  %s2109_s7 = sshll.u32 %s270_s9, 7 }
  0x27   : > { %s2703_s10 = sshll.u32 %s3238_s24, 7  ;;  %s274_s16 = scalar_lea.vmem [#allocation2], %s2109_s7 }
  0x28   : > { %s280_s14 = scalar_lea.hbm %s3756_s0, %s2703_s10  ;;  %s283_s17 = sshll.u32 %s274_s16, 4  ;;  %s284_s17 = int_to_ptr.vmem [resolvable:$true] %s283_s17 }
  0x29   : > { %s281_s15 = sshll.u32 %s280_s14, 4  ;;  %p3396_p7 = pnand %p2918_p4, %p3370_p12  ;;  %s282_s15 = int_to_ptr.hbm [resolvable:$true] %s281_s15 }
  0x2a   : > { %s271_s20 = scalar_lea.sflag [#allocation3], %s270_s9  ;;  %s3130_s25 = sshra.s32 %s282_s15, 4  ;;  %s3131_s25 = int_to_ptr.hbm [resolvable:$true] %s3130_s25 }
  0x2b   : > { %s3132_s1 = scalar_lea.hbm %s3131_s25, 128  ;;  %p3134_p9 = pneg %p3396_p7 }
  0x2c   : > { %p3133_p8 = scmp.ne.s32.totalorder %s3131_s25, %s3132_s1  ;;  %s3137_s12 = scalar_lea.hbm %s3756_s0, 256 }
  0x2d   : > { %p3138_p12 = scmp.lt.s32.totalorder %s3131_s25, %s3756_s0  ;;  %p3139_p2 = scmp.lt.s32.totalorder %s3137_s12, %s3132_s1 }
  0x2e   : > { %p3135_p10 = pnand %p3134_p9, %p3133_p8 }
  0x2f   : > { %p3140_p4 = por %p3139_p2, %p3138_p12 }
  0x30   : > { %p3136_p11 = pneg %p3135_p10 }
  0x32   : > { %p3141_p5 = pnand %p3140_p4, %p3136_p11 }
  0x34   : > { %3144 = shalt.err (!%p3141_p5)
}
  0x35   : > { %s3251_s9 = smov 256   ;;  %s3252_s14 = smov 16  }
  0x36   : > { %2908 = dma.hbm_to_vmem [thread:$0]  (!%p3396_p7), %s282_s15, 2048, %s284_s17, %s271_s20, %s3251_s9, %s3251_s9, %s3252_s14  }
  0x37   : > { %295 = sbr.rel (%p3319_p3) target bundleno = 911 (0x38f), region = 44  ;;  %s3413_s16 = sand.u32 (!%p3319_p3), 1, %s3230_s22  }
  0x38   : > { %s2114_s10 = sshll.u32 (!%p3319_p3), %s3413_s16, 7  ;;  %s298_s25 = scalar_lea.sflag (!%p3319_p3), [#allocation3], %s3413_s16 }
  0x39   : > { %s3417_s1 = scalar_lea.vmem (!%p3319_p3), [#allocation2], %s2114_s10 }
  0x3c   : > { %3205 = dma.done.wait (%p3376_p13), %s298_s25, 2048  }
  0x3d   : > { %3207 = vsyncadd (%p3376_p13), %s298_s25, 4294965248 }
  0x3e   : > { %3209 = dma.done.wait (%p46_p1), [#allocation6], 8256  }
  0x3f   : > { %3211 = vsyncadd (%p46_p1), [#allocation6], 4294959040 }
  0x40   : > { %3213 = dma.done.wait (%p46_p1), [#allocation9], 8256  }
  0x41   : > { %3215 = vsyncadd (%p46_p1), [#allocation9], 4294959040 }
  0x42   : > { %3217 = dma.done.wait (%p46_p1), [#allocation12], 2048  }
  0x43   : > { %3219 = vsyncadd (%p46_p1), [#allocation12], 4294965248  ;;  %v2179_v0 = vld [vmem:[#allocation5 + $0x70] sm:$0xf]  ;;  %v2719_v1 = vld [vmem:[#allocation5 + $0x74] sm:$0xf0] }
  0x44   : > { %v2243_v2 = vld [vmem:[#allocation5 + $0xf0] sm:$0xf]  ;;  %v2180_v3 = vor.u32 %v2719_v1, %v2179_v0  ;;  %v2735_v4 = vld [vmem:[#allocation5 + $0xf4] sm:$0xf0]  ;;  %v2171_v5 = vld [vmem:[#allocation5 + $0x60] sm:$0xf] }
  0x45   : > { %v2717_v6 = vld [vmem:[#allocation5 + $0x64] sm:$0xf0]  ;;  %v2244_v7 = vor.u32 %v2735_v4, %v2243_v2  ;;  %v2235_v8 = vld [vmem:[#allocation5 + $0xe0] sm:$0xf]  ;;  %v2163_v12 = vld [vmem:[#allocation5 + $0x50] sm:$0xf] }
  0x46   : > { %v2733_v9 = vld [vmem:[#allocation5 + $0xe4] sm:$0xf0]  ;;  %580 = vmatpush.bf16.msra.mxu0 %v2180_v3  ;;  %2849 = vmatpush.bf16.msra.mxu2 %v2180_v3  ;;  %v2172_v10 = vor.u32 %v2717_v6, %v2171_v5  ;;  %v2715_v13 = vld [vmem:[#allocation5 + $0x54] sm:$0xf0]  ;;  %v2227_v14 = vld [vmem:[#allocation5 + $0xd0] sm:$0xf] }
  0x47   : > { %2857 = vmatpush.bf16.msra.mxu3 %v2244_v7  ;;  %609 = vmatpush.bf16.msra.mxu1 %v2244_v7  ;;  %v2236_v11 = vor.u32 %v2733_v9, %v2235_v8  ;;  %v2731_v15 = vld [vmem:[#allocation5 + $0xd4] sm:$0xf0]  ;;  %v2164_v16 = vor.u32 %v2715_v13, %v2163_v12  ;;  %v2155_v18 = vld [vmem:[#allocation5 + $0x40] sm:$0xf]  ;;  %v2713_v19 = vld [vmem:[#allocation5 + $0x44] sm:$0xf0] }
  0x48   : > { %v2228_v17 = vor.u32 %v2731_v15, %v2227_v14  ;;  %v2219_v20 = vld [vmem:[#allocation5 + $0xc0] sm:$0xf]  ;;  %v2729_v21 = vld [vmem:[#allocation5 + $0xc4] sm:$0xf0]  ;;  %v2156_v22 = vor.u32 %v2713_v19, %v2155_v18  ;;  %v2147_v24 = vld [vmem:[#allocation5 + $0x30] sm:$0xf] }
  0x49   : > { %v2220_v23 = vor.u32 %v2729_v21, %v2219_v20  ;;  %v2711_v25 = vld [vmem:[#allocation5 + $0x34] sm:$0xf0]  ;;  %v2211_v26 = vld [vmem:[#allocation5 + $0xb0] sm:$0xf]  ;;  %v2139_v30 = vld [vmem:[#allocation5 + $0x20] sm:$0xf] }
  0x4a   : > { %581 = vmatpush.bf16.msra.mxu0 %v2172_v10  ;;  %2850 = vmatpush.bf16.msra.mxu2 %v2172_v10  ;;  %v2727_v27 = vld [vmem:[#allocation5 + $0xb4] sm:$0xf0]  ;;  %v2148_v28 = vor.u32 %v2711_v25, %v2147_v24  ;;  %v2709_v31 = vld [vmem:[#allocation5 + $0x24] sm:$0xf0]  ;;  %v2203_v32 = vld [vmem:[#allocation5 + $0xa0] sm:$0xf] }
  0x4b   : > { %2858 = vmatpush.bf16.msra.mxu3 %v2236_v11  ;;  %610 = vmatpush.bf16.msra.mxu1 %v2236_v11  ;;  %v2212_v29 = vor.u32 %v2727_v27, %v2211_v26  ;;  %v2725_v33 = vld [vmem:[#allocation5 + $0xa4] sm:$0xf0]  ;;  %v2140_v34 = vor.u32 %v2709_v31, %v2139_v30  ;;  %v2131_v36 = vld [vmem:[#allocation5 + $0x10] sm:$0xf]  ;;  %v2707_v37 = vld [vmem:[#allocation5 + $0x14] sm:$0xf0] }
  0x4c   : > { %v2204_v35 = vor.u32 %v2725_v33, %v2203_v32  ;;  %v2195_v38 = vld [vmem:[#allocation5 + $0x90] sm:$0xf]  ;;  %v2723_v39 = vld [vmem:[#allocation5 + $0x94] sm:$0xf0]  ;;  %v2132_v40 = vor.u32 %v2707_v37, %v2131_v36  ;;  %v2123_v41 = vld [vmem:[#allocation5] sm:$0xf] }
  0x4d   : > { %v2196_v42 = vor.u32 %v2723_v39, %v2195_v38  ;;  %v2705_v43 = vld [vmem:[#allocation5 + $0x4] sm:$0xf0]  ;;  %v2187_v44 = vld [vmem:[#allocation5 + $0x80] sm:$0xf]  ;;  %v3439_v47 = vld [vmem:[%s3417_s1 + $0x10] sm:$0xff]  ;;  %s2120_s29 = sshll.u32 %s3413_s16, 6 }
  0x4e   : > { %582 = vmatpush.bf16.msra.mxu0 %v2164_v16  ;;  %2851 = vmatpush.bf16.msra.mxu2 %v2164_v16  ;;  %v2721_v45 = vld [vmem:[#allocation5 + $0x84] sm:$0xf0]  ;;  %v3436_v46 = vld [vmem:[%s3417_s1] sm:$0xff]  ;;  %v2718_v48 = vld [vmem:[#allocation5 + $0x74] sm:$0xf]  ;;  %v2124_v52 = vor.u32 %v2705_v43, %v2123_v41  ;;  %s3712_s11 = scalar_lea.vmem [#allocation13], %s2120_s29 }
  0x4f   : > { %2859 = vmatpush.bf16.msra.mxu3 %v2228_v17  ;;  %611 = vmatpush.bf16.msra.mxu1 %v2228_v17  ;;  %v2181_v49 = vld [vmem:[#allocation5 + $0x78] sm:$0xf0]  ;;  %v2734_v50 = vld [vmem:[#allocation5 + $0xf4] sm:$0xf]  ;;  %v366_v53 = vld [vmem:[%s3417_s1 + $0x40] sm:$0xff]  ;;  %v2188_v56 = vor.u32 %v2721_v45, %v2187_v44  ;;  %v3453_v63 = vpack.c.bf16 %v3439_v47, %v3436_v46  ;;  %s2848_s15 = sshll.u32 %s3314_s28, 6 }
  0x50   : > { %v2245_v51 = vld [vmem:[#allocation5 + $0xf8] sm:$0xf0]  ;;  %v368_v54 = vld [vmem:[%s3417_s1 + $0x50] sm:$0xff]  ;;  %v367_v55 = vld [vmem:[%s3417_s1 + $0x48] sm:$0xff]  ;;  %v2184_v60 = vor.u32 %v2718_v48, %v2181_v49  ;;  %s1976_s20 = scalar_lea.hbm %s3762_s6, %s2848_s15  ;;  %s1977_s7 = sshll.u32 %s3712_s11, 4  ;;  %s1978_s7 = int_to_ptr.vmem [resolvable:$true] %s1977_s7 }
  0x51   : > { %v369_v57 = vld [vmem:[%s3417_s1 + $0x58] sm:$0xff]  ;;  %v3446_v58 = vld [vmem:[%s3417_s1 + $0x8] sm:$0xff]  ;;  %v2248_v61 = vor.u32 %v2734_v50, %v2245_v51  ;;  %v2716_v62 = vld [vmem:[#allocation5 + $0x64] sm:$0xf]  ;;  %v3455_v0 = vpack.c.bf16 %v368_v54, %v366_v53  ;;  %s1979_s12 = sshll.u32 %s1976_s20, 4  ;;  %s1965_s13 = scalar_lea.sflag [#allocation4], %s3413_s16  ;;  %s1980_s12 = int_to_ptr.hbm [resolvable:$true] %s1979_s12 }
  0x52   : > { %583 = vmatpush.bf16.msra.mxu0 %v2156_v22  ;;  %2852 = vmatpush.bf16.msra.mxu2 %v2156_v22  ;;  %v3449_v59 = vld [vmem:[%s3417_s1 + $0x18] sm:$0xff]  ;;  %v2173_v1 = vld [vmem:[#allocation5 + $0x68] sm:$0xf0]  ;;  %v2732_v2 = vld [vmem:[#allocation5 + $0xe4] sm:$0xf]  ;;  %v3457_v4 = vpack.c.bf16 %v369_v57, %v367_v55  ;;  %s3174_s30 = sshra.s32 %s1980_s12, 4  ;;  %s3175_s30 = int_to_ptr.hbm [resolvable:$true] %s3174_s30 }
  0x53   : > { %2860 = vmatpush.bf16.msra.mxu3 %v2220_v23  ;;  %612 = vmatpush.bf16.msra.mxu1 %v2220_v23  ;;  %v2237_v3 = vld [vmem:[#allocation5 + $0xe8] sm:$0xf0]  ;;  %v3461_v5 = vpack.c.bf16 %v3449_v59, %v3446_v58  ;;  %v2176_v6 = vor.u32 %v2716_v62, %v2173_v1  ;;  %v2714_v8 = vld [vmem:[#allocation5 + $0x54] sm:$0xf]  ;;  %v2165_v9 = vld [vmem:[#allocation5 + $0x58] sm:$0xf0]  ;;  %p3181_p13 = scmp.lt.s32.totalorder %s3175_s30, %s3762_s6 }
  0x54   : > { %v2240_v7 = vor.u32 %v2732_v2, %v2237_v3  ;;  %v2730_v10 = vld [vmem:[#allocation5 + $0xd4] sm:$0xf]  ;;  %v2229_v11 = vld [vmem:[#allocation5 + $0xd8] sm:$0xf0]  ;;  %v2168_v12 = vor.u32 %v2714_v8, %v2165_v9  ;;  %v2712_v14 = vld [vmem:[#allocation5 + $0x44] sm:$0xf] }
  0x55   : > { %v2232_v13 = vor.u32 %v2730_v10, %v2229_v11  ;;  %v2157_v15 = vld [vmem:[#allocation5 + $0x48] sm:$0xf0]  ;;  %v2728_v16 = vld [vmem:[#allocation5 + $0xc4] sm:$0xf]  ;;  %v3471_v21 = vld [vmem:[%s3417_s1 + $0x30] sm:$0xff]  ;;  %s3176_s28 = scalar_lea.hbm %s3175_s30, 64 }
  0x56   : > { %584 = vmatpush.bf16.msra.mxu0 %v2148_v28  ;;  %2853 = vmatpush.bf16.msra.mxu2 %v2148_v28  ;;  %v2221_v17 = vld [vmem:[#allocation5 + $0xc8] sm:$0xf0]  ;;  %v2160_v18 = vor.u32 %v2712_v14, %v2157_v15  ;;  %v3468_v20 = vld [vmem:[%s3417_s1 + $0x20] sm:$0xff]  ;;  %v2710_v22 = vld [vmem:[#allocation5 + $0x34] sm:$0xf]  ;;  %p3177_p1 = scmp.ne.s32.totalorder %s3175_s30, %s3176_s28  ;;  %s3180_s10 = scalar_lea.hbm %s3762_s6, 128 }
  0x57   : > { %2861 = vmatpush.bf16.msra.mxu3 %v2212_v29  ;;  %613 = vmatpush.bf16.msra.mxu1 %v2212_v29  ;;  %v2224_v19 = vor.u32 %v2728_v16, %v2221_v17  ;;  %v2149_v23 = vld [vmem:[#allocation5 + $0x38] sm:$0xf0]  ;;  %v2726_v24 = vld [vmem:[#allocation5 + $0xb4] sm:$0xf]  ;;  %v370_v26 = vld [vmem:[%s3417_s1 + $0x60] sm:$0xff]  ;;  %p3182_p7 = scmp.lt.s32.totalorder %s3180_s10, %s3176_s28 }
  0x58   : > { %v2213_v25 = vld [vmem:[#allocation5 + $0xb8] sm:$0xf0]  ;;  %v372_v27 = vld [vmem:[%s3417_s1 + $0x70] sm:$0xff]  ;;  %v371_v28 = vld [vmem:[%s3417_s1 + $0x68] sm:$0xff]  ;;  %v2152_v32 = vor.u32 %v2710_v22, %v2149_v23  ;;  %p3178_p3 = pnand %p3177_p1, %p3380_p0 }
  0x59   : > { %v373_v29 = vld [vmem:[%s3417_s1 + $0x78] sm:$0xff]  ;;  %v3478_v30 = vld [vmem:[%s3417_s1 + $0x28] sm:$0xff]  ;;  %v2216_v33 = vor.u32 %v2726_v24, %v2213_v25  ;;  %v3485_v36 = vpack.c.bf16 %v372_v27, %v370_v26  ;;  %v2724_v38 = vld [vmem:[#allocation5 + $0xa4] sm:$0xf]  ;;  %p3183_p8 = por %p3182_p7, %p3181_p13 }
  0x5a   : > { %585 = vmatpush.bf16.msra.mxu0 %v2140_v34  ;;  %2854 = vmatpush.bf16.msra.mxu2 %v2140_v34  ;;  %v3481_v31 = vld [vmem:[%s3417_s1 + $0x38] sm:$0xff]  ;;  %v2708_v34 = vld [vmem:[#allocation5 + $0x24] sm:$0xf]  ;;  %v2141_v37 = vld [vmem:[#allocation5 + $0x28] sm:$0xf0]  ;;  %p3179_p5 = pneg %p3178_p3 }
  0x5b   : > { %2862 = vmatpush.bf16.msra.mxu3 %v2204_v35  ;;  %614 = vmatpush.bf16.msra.mxu1 %v2204_v35  ;;  %v376_v35 = vpack.c.bf16 %v3471_v21, %v3468_v20  ;;  %v2205_v39 = vld [vmem:[#allocation5 + $0xa8] sm:$0xf0]  ;;  %v377_v41 = vpack.c.bf16 %v3481_v31, %v3478_v30  ;;  %v2706_v44 = vld [vmem:[#allocation5 + $0x14] sm:$0xf]  ;;  %v2133_v45 = vld [vmem:[#allocation5 + $0x18] sm:$0xf0] }
  0x5c   : > { %v2208_v43 = vor.u32 %v2724_v38, %v2205_v39  ;;  %v2722_v48 = vld [vmem:[#allocation5 + $0x94] sm:$0xf]  ;;  %v2197_v49 = vld [vmem:[#allocation5 + $0x98] sm:$0xf0]  ;;  %v2136_v50 = vor.u32 %v2706_v44, %v2133_v45  ;;  %v2125_v53 = vld [vmem:[#allocation5 + $0x8] sm:$0xf0]  ;;  %p3184_p9 = pnand %p3183_p8, %p3179_p5 }
  0x5d   : > { %v2200_v51 = vor.u32 %v2722_v48, %v2197_v49  ;;  %v2720_v54 = vld [vmem:[#allocation5 + $0x84] sm:$0xf]  ;;  %v2189_v55 = vld [vmem:[#allocation5 + $0x88] sm:$0xf0]  ;;  %v2750_v62 = vld [vmem:[#allocation8 + $0x74] sm:$0xf] }
  0x5e   : > { %586 = vmatpush.bf16.msra.mxu0 %v2132_v40  ;;  %2855 = vmatpush.bf16.msra.mxu2 %v2132_v40  ;;  %v3487_v40 = vpack.c.bf16 %v373_v29, %v371_v28  ;;  %v2192_v57 = vor.u32 %v2720_v54, %v2189_v55  ;;  %v2309_v2 = vld [vmem:[#allocation8 + $0x78] sm:$0xf0]  ;;  %v2299_v3 = vld [vmem:[#allocation8 + $0x60] sm:$0xf]  ;;  %v2748_v8 = vld [vmem:[#allocation8 + $0x64] sm:$0xf] }
  0x5f   : > { %2863 = vmatpush.bf16.msra.mxu3 %v2196_v42  ;;  %615 = vmatpush.bf16.msra.mxu1 %v2196_v42  ;;  %v2144_v42 = vor.u32 %v2708_v34, %v2141_v37  ;;  %v2301_v9 = vld [vmem:[#allocation8 + $0x68] sm:$0xf0]  ;;  %v2766_v10 = vld [vmem:[#allocation8 + $0xf4] sm:$0xf]  ;;  %v2747_v14 = vld [vmem:[#allocation8 + $0x54] sm:$0xf0] }
  0x60   : > { %v2746_v15 = vld [vmem:[#allocation8 + $0x54] sm:$0xf]  ;;  %v2293_v16 = vld [vmem:[#allocation8 + $0x58] sm:$0xf0]  ;;  %v2764_v17 = vld [vmem:[#allocation8 + $0xe4] sm:$0xf] }
  0x61   : > { %v2296_v23 = vor.u32 %v2746_v15, %v2293_v16  ;;  %v2283_v24 = vld [vmem:[#allocation8 + $0x40] sm:$0xf]  ;;  %v2745_v25 = vld [vmem:[#allocation8 + $0x44] sm:$0xf0]  ;;  %v2744_v26 = vld [vmem:[#allocation8 + $0x44] sm:$0xf] }
  0x62   : > { %587 = vmatpush.bf16.msra.mxu0 %v2124_v52  ;;  %2856 = vmatpush.bf16.msra.mxu2 %v2124_v52  ;;  %v2704_v52 = vld [vmem:[#allocation5 + $0x4] sm:$0xf]  ;;  %v2285_v27 = vld [vmem:[#allocation8 + $0x48] sm:$0xf0]  ;;  %v2284_v28 = vor.u32 %v2745_v25, %v2283_v24  ;;  %v2742_v34 = vld [vmem:[#allocation8 + $0x34] sm:$0xf] }
  0x63   : > { %2864 = vmatpush.bf16.msra.mxu3 %v2188_v56  ;;  %616 = vmatpush.bf16.msra.mxu1 %v2188_v56  ;;  %v2128_v56 = vor.u32 %v2704_v52, %v2125_v53  ;;  %v2288_v29 = vor.u32 %v2744_v26, %v2285_v27  ;;  %v2277_v37 = vld [vmem:[#allocation8 + $0x38] sm:$0xf0]  ;;  %v2267_v39 = vld [vmem:[#allocation8 + $0x20] sm:$0xf]  ;;  %v2738_v45 = vld [vmem:[#allocation8 + $0x14] sm:$0xf] }
  0x64   : > { %v2280_v38 = vor.u32 %v2742_v34, %v2277_v37  ;;  %v2261_v48 = vld [vmem:[#allocation8 + $0x18] sm:$0xf0]  ;;  %v2251_v53 = vld [vmem:[#allocation8] sm:$0xf]  ;;  %v2737_v54 = vld [vmem:[#allocation8 + $0x4] sm:$0xf0] }
  0x65   : > { %588 = vmatmul.bf16.vlgmr.msra.gmra.mxu0 %v3453_v63  ;;  %598 = vmatmul.bf16.vlgmr.msra.gmra.mxu2 %v3455_v0  ;;  %v2264_v49 = vor.u32 %v2738_v45, %v2261_v48  ;;  %v2736_v55 = vld [vmem:[#allocation8 + $0x4] sm:$0xf]  ;;  %v2333_v24 = vld [vmem:[#allocation8 + $0xa8] sm:$0xf0]  ;;  %v2323_v48 = vld [vmem:[#allocation8 + $0x90] sm:$0xf] }
  0x66   : > { %638 = vmatpush.bf16.msrb.mxu2 %v2184_v60  ;;  %627 = vmatmul.bf16.vlgmr.msra.gmra.mxu3 %v3457_v4  ;;  %v2307_v60 = vld [vmem:[#allocation8 + $0x70] sm:$0xf] }
  0x67   : > { %667 = vmatpush.bf16.msrb.mxu3 %v2248_v61  ;;  %617 = vmatmul.bf16.vlgmr.msra.gmra.mxu1 %v3461_v5  ;;  %v2751_v61 = vld [vmem:[#allocation8 + $0x74] sm:$0xf0] }
  0x68   : > { %v2308_v1 = vor.u32 %v2751_v61, %v2307_v60  ;;  %v2760_v61 = vld [vmem:[#allocation8 + $0xc4] sm:$0xf] }
  0x6a   : > { %639 = vmatpush.bf16.msrb.mxu2 %v2176_v6  ;;  %v2749_v6 = vld [vmem:[#allocation8 + $0x64] sm:$0xf0]  ;;  %918 = vmatpush.bf16.msrb.mxu0 %v2308_v1 }
  0x6b   : > { %668 = vmatpush.bf16.msrb.mxu3 %v2240_v7  ;;  %v2312_v7 = vor.u32 %v2750_v62, %v2309_v2  ;;  %v2300_v11 = vor.u32 %v2749_v6, %v2299_v3  ;;  %v2349_v62 = vld [vmem:[#allocation8 + $0xc8] sm:$0xf0]  ;;  %v2371_v2 = vld [vmem:[#allocation8 + $0xf0] sm:$0xf]  ;;  %v2767_v3 = vld [vmem:[#allocation8 + $0xf4] sm:$0xf0] }
  0x6c   : > { %v2352_v1 = vor.u32 %v2760_v61, %v2349_v62  ;;  %v2372_v6 = vor.u32 %v2767_v3, %v2371_v2  ;;  %v2753_v62 = vld [vmem:[#allocation8 + $0x84] sm:$0xf0] }
  0x6e   : > { %640 = vmatpush.bf16.msrb.mxu2 %v2168_v12  ;;  %v2373_v12 = vld [vmem:[#allocation8 + $0xf8] sm:$0xf0]  ;;  %919 = vmatpush.bf16.msrb.mxu0 %v2300_v11 }
  0x6f   : > { %669 = vmatpush.bf16.msrb.mxu3 %v2232_v13  ;;  %v2376_v13 = vor.u32 %v2766_v10, %v2373_v12  ;;  %947 = vmatpush.bf16.msrb.mxu1 %v2372_v6  ;;  %v2341_v10 = vld [vmem:[#allocation8 + $0xb8] sm:$0xf0] }
  0x72   : > { %641 = vmatpush.bf16.msrb.mxu2 %v2160_v18  ;;  %v2365_v18 = vld [vmem:[#allocation8 + $0xe8] sm:$0xf0] }
  0x73   : > { %670 = vmatpush.bf16.msrb.mxu3 %v2224_v19  ;;  %v2368_v22 = vor.u32 %v2764_v17, %v2365_v18  ;;  %v2347_v18 = vld [vmem:[#allocation8 + $0xc0] sm:$0xf] }
  0x75   : > { %593 = vmatmul.bf16.gmra.mxu0 %v376_v35  ;;  %603 = vmatmul.bf16.gmra.mxu2 %v3485_v36 }
  0x76   : > { %642 = vmatpush.bf16.msrb.mxu2 %v2152_v32  ;;  %632 = vmatmul.bf16.gmra.mxu3 %v3487_v40  ;;  %v2275_v32 = vld [vmem:[#allocation8 + $0x30] sm:$0xf] }
  0x77   : > { %671 = vmatpush.bf16.msrb.mxu3 %v2216_v33  ;;  %622 = vmatmul.bf16.gmra.mxu1 %v377_v41  ;;  %v2743_v33 = vld [vmem:[#allocation8 + $0x34] sm:$0xf0] }
  0x7a   : > { %643 = vmatpush.bf16.msrb.mxu2 %v2144_v42  ;;  %v2740_v42 = vld [vmem:[#allocation8 + $0x24] sm:$0xf] }
  0x7b   : > { %672 = vmatpush.bf16.msrb.mxu3 %v2208_v43  ;;  %v2269_v43 = vld [vmem:[#allocation8 + $0x28] sm:$0xf0] }
  0x7c   : > { %v2272_v44 = vor.u32 %v2740_v42, %v2269_v43  ;;  %v2754_v43 = vld [vmem:[#allocation8 + $0x94] sm:$0xf] }
  0x7e   : > { %644 = vmatpush.bf16.msrb.mxu2 %v2136_v50  ;;  %v2762_v50 = vld [vmem:[#allocation8 + $0xd4] sm:$0xf] }
  0x7f   : > { %673 = vmatpush.bf16.msrb.mxu3 %v2200_v51  ;;  %v2357_v51 = vld [vmem:[#allocation8 + $0xd8] sm:$0xf0] }
  0x80   : > { %v2360_v52 = vor.u32 %v2762_v50, %v2357_v51 }
  0x82   : > { %645 = vmatpush.bf16.msrb.mxu2 %v2128_v56  ;;  %v2252_v56 = vor.u32 %v2737_v54, %v2251_v53 }
  0x83   : > { %674 = vmatpush.bf16.msrb.mxu3 %v2192_v57  ;;  %v2253_v57 = vld [vmem:[#allocation8 + $0x8] sm:$0xf0] }
  0x84   : > { %v2256_v60 = vor.u32 %v2736_v55, %v2253_v57  ;;  %v2752_v55 = vld [vmem:[#allocation8 + $0x84] sm:$0xf]  ;;  %v2315_v57 = vld [vmem:[#allocation8 + $0x80] sm:$0xf] }
  0x85   : > { %646 = vmatmul.bf16.vlgmr.msrb.gmra.mxu2 %v3453_v63  ;;  %v2304_v63 = vor.u32 %v2748_v8, %v2301_v9  ;;  %v2765_v8 = vld [vmem:[#allocation8 + $0xe4] sm:$0xf0]  ;;  %v2758_v9 = vld [vmem:[#allocation8 + $0xb4] sm:$0xf] }
  0x86   : > { %675 = vmatmul.bf16.vlgmr.msrb.gmra.mxu3 %v3461_v5  ;;  %976 = vmatpush.bf16.msra.mxu2 %v2312_v7  ;;  %v2291_v5 = vld [vmem:[#allocation8 + $0x50] sm:$0xf]  ;;  %v2363_v7 = vld [vmem:[#allocation8 + $0xe0] sm:$0xf]  ;;  %v2344_v12 = vor.u32 %v2758_v9, %v2341_v10 }
  0x87   : > { %1005 = vmatpush.bf16.msra.mxu3 %v2376_v13  ;;  %v2292_v19 = vor.u32 %v2747_v14, %v2291_v5  ;;  %v2364_v11 = vor.u32 %v2765_v8, %v2363_v7  ;;  %v2355_v13 = vld [vmem:[#allocation8 + $0xd0] sm:$0xf]  ;;  %v2763_v5 = vld [vmem:[#allocation8 + $0xd4] sm:$0xf0] }
  0x88   : > { %v2356_v14 = vor.u32 %v2763_v5, %v2355_v13 }
  0x89   : > { %920 = vmatpush.bf16.msrb.mxu0 %v2292_v19  ;;  %948 = vmatpush.bf16.msrb.mxu1 %v2364_v11  ;;  %v2761_v19 = vld [vmem:[#allocation8 + $0xc4] sm:$0xf0] }
  0x8a   : > { %977 = vmatpush.bf16.msra.mxu2 %v2304_v63  ;;  %v3499_v63 = vld [vmem:[#allocation7] sm:$0x3]  ;;  %v2348_v25 = vor.u32 %v2761_v19, %v2347_v18 }
  0x8b   : > { %1006 = vmatpush.bf16.msra.mxu3 %v2368_v22  ;;  %v3502_v16 = vperm.slane %v3499_v63, 0 }
  0x8d   : > { %921 = vmatpush.bf16.msrb.mxu0 %v2284_v28  ;;  %949 = vmatpush.bf16.msrb.mxu1 %v2356_v14  ;;  %v2339_v28 = vld [vmem:[#allocation8 + $0xb0] sm:$0xf] }
  0x8e   : > { %978 = vmatpush.bf16.msra.mxu2 %v2296_v23  ;;  %v2756_v23 = vld [vmem:[#allocation8 + $0xa4] sm:$0xf] }
  0x8f   : > { %1007 = vmatpush.bf16.msra.mxu3 %v2360_v52  ;;  %v2336_v26 = vor.u32 %v2756_v23, %v2333_v24 }
  0x91   : > { %950 = vmatpush.bf16.msrb.mxu1 %v2348_v25 }
  0x92   : > { %979 = vmatpush.bf16.msra.mxu2 %v2288_v29  ;;  %v2759_v29 = vld [vmem:[#allocation8 + $0xb4] sm:$0xf0] }
  0x93   : > { %1008 = vmatpush.bf16.msra.mxu3 %v2352_v1  ;;  %v2340_v34 = vor.u32 %v2759_v29, %v2339_v28  ;;  %v2316_v1 = vor.u32 %v2753_v62, %v2315_v57  ;;  %v2782_v57 = vld [vmem:[#allocation5 + $0x174] sm:$0xf] }
  0x95   : > { %651 = vmatmul.bf16.gmra.mxu2 %v376_v35  ;;  %v2276_v35 = vor.u32 %v2743_v33, %v2275_v32  ;;  %951 = vmatpush.bf16.msrb.mxu1 %v2340_v34 }
  0x96   : > { %680 = vmatmul.bf16.gmra.mxu3 %v377_v41  ;;  %980 = vmatpush.bf16.msra.mxu2 %v2280_v38  ;;  %v2741_v41 = vld [vmem:[#allocation8 + $0x24] sm:$0xf0] }
  0x97   : > { %922 = vmatpush.bf16.msrb.mxu0 %v2276_v35  ;;  %1009 = vmatpush.bf16.msra.mxu3 %v2344_v12 }
  0x9a   : > { %981 = vmatpush.bf16.msra.mxu2 %v2272_v44  ;;  %v2325_v44 = vld [vmem:[#allocation8 + $0x98] sm:$0xf0] }
  0x9b   : > { %1010 = vmatpush.bf16.msra.mxu3 %v2336_v26 }
  0x9e   : > { %982 = vmatpush.bf16.msra.mxu2 %v2264_v49  ;;  %v2755_v49 = vld [vmem:[#allocation8 + $0x94] sm:$0xf0] }
  0x9f   : > { %v2324_v52 = vor.u32 %v2755_v49, %v2323_v48 }
  0xa2   : > { %983 = vmatpush.bf16.msra.mxu2 %v2256_v60 }
  0xa5   : > { %656 = vmatmul.bf16.gmra.mxu2 %v3455_v0  ;;  %v2268_v0 = vor.u32 %v2741_v41, %v2267_v39  ;;  %v2331_v39 = vld [vmem:[#allocation8 + $0xa0] sm:$0xf]  ;;  %v2757_v41 = vld [vmem:[#allocation8 + $0xa4] sm:$0xf0] }
  0xa6   : > { %685 = vmatmul.bf16.gmra.mxu3 %v3457_v4  ;;  %v2259_v4 = vld [vmem:[#allocation8 + $0x10] sm:$0xf] }
  0xa7   : > { %923 = vmatpush.bf16.msrb.mxu0 %v2268_v0 }
  0xb5   : > { %661 = vmatmul.bf16.gmra.mxu2 %v3485_v36  ;;  %v2739_v36 = vld [vmem:[#allocation8 + $0x14] sm:$0xf0] }
  0xb6   : > { %690 = vmatmul.bf16.gmra.mxu3 %v3487_v40  ;;  %v2260_v40 = vor.u32 %v2739_v36, %v2259_v4  ;;  %v2332_v4 = vor.u32 %v2757_v41, %v2331_v39  ;;  %v2328_v36 = vor.u32 %v2754_v43, %v2325_v44 }
  0xb8   : > { %924 = vmatpush.bf16.msrb.mxu0 %v2260_v40  ;;  %952 = vmatpush.bf16.msrb.mxu1 %v2332_v4 }
  0xb9   : > { %1011 = vmatpush.bf16.msra.mxu3 %v2328_v36 }
  0xbc   : > { %925 = vmatpush.bf16.msrb.mxu0 %v2252_v56  ;;  %v2317_v56 = vld [vmem:[#allocation8 + $0x88] sm:$0xf0]  ;;  %953 = vmatpush.bf16.msrb.mxu1 %v2324_v52 }
  0xbd   : > { %v2320_v61 = vor.u32 %v2752_v55, %v2317_v56 }
  0xbf   : > { %1012 = vmatpush.bf16.msra.mxu3 %v2320_v61  ;;  %v2798_v61 = vld [vmem:[#allocation5 + $0x1f4] sm:$0xf] }
  0xc0   : > { %954 = vmatpush.bf16.msrb.mxu1 %v2316_v1  ;;  %v2501_v1 = vld [vmem:[#allocation5 + $0x1f8] sm:$0xf0] }
  0xe2   : > { %v589_v15 = vpop.f32.mrf.mxu0 }
  0xe3   : > { %v590_v22 = vadd.f32 %v589_v15, %v3502_v16 }
  0xe4   : > { %v618_v17 = vpop.f32.mrf.mxu1 }
  0xe5   : > { %v619_v32 = vadd.f32 %v618_v17, %v590_v22  ;;  %v3511_v22 = vperm.slane %v3499_v63, 1 }
  0xe7   : > { %v696_v42 = vmax.f32 %v619_v32, 0.0 }
  0xe8   : > { %v599_v27 = vpop.f32.mrf.mxu2 }
  0xe9   : > { %v628_v33 = vpop.f32.mrf.mxu3  ;;  %v600_v17 = vadd.f32 %v599_v27, %v3502_v16 }
  0xea   : > { %v591_v35 = vpop.f32.mrf.mxu0 }
  0xeb   : > { %v592_v37 = vadd.f32 %v591_v35, %v3502_v16  ;;  %v629_v24 = vadd.f32 %v628_v33, %v600_v17 }
  0xec   : > { %v620_v38 = vpop.f32.mrf.mxu1 }
  0xed   : > { %v621_v0 = vadd.f32 %v620_v38, %v592_v37  ;;  %v704_v28 = vmax.f32 %v629_v24, 0.0 }
  0xef   : > { %v698_v45 = vmax.f32 %v621_v0, 0.0 }
  0xf0   : > { %v601_v40 = vpop.f32.mrf.mxu2 }
  0xf1   : > { %v630_v50 = vpop.f32.mrf.mxu3  ;;  %v712_v51 = vpack.c.bf16 %v698_v45, %v696_v42  ;;  %v602_v15 = vadd.f32 %v601_v40, %v3502_v16 }
  0xf2   : > { %v594_v53 = vpop.f32.mrf.mxu0 }
  0xf3   : > { %926 = vmatmul.bf16.vlgmr.msrb.gmra.mxu0 %v712_v51  ;;  %984 = vmatmul.bf16.vlgmr.msra.gmra.mxu2 %v712_v51  ;;  %v595_v60 = vadd.f32 %v594_v53, %v3502_v16  ;;  %v631_v19 = vadd.f32 %v630_v50, %v602_v15 }
  0xf4   : > { %v623_v54 = vpop.f32.mrf.mxu1 }
  0xf5   : > { %v624_v3 = vadd.f32 %v623_v54, %v595_v60  ;;  %v706_v25 = vmax.f32 %v631_v19, 0.0  ;;  %v2437_v60 = vld [vmem:[#allocation5 + $0x178] sm:$0xf0] }
  0xf6   : > { %v2440_v62 = vor.u32 %v2782_v57, %v2437_v60  ;;  %v2413_v60 = vld [vmem:[#allocation5 + $0x148] sm:$0xf0] }
  0xf7   : > { %v700_v10 = vmax.f32 %v624_v3, 0.0  ;;  %v716_v37 = vpack.c.bf16 %v706_v25, %v704_v28  ;;  %v2783_v3 = vld [vmem:[#allocation5 + $0x174] sm:$0xf0] }
  0xf8   : > { %v604_v2 = vpop.f32.mrf.mxu2  ;;  %1332 = vmatpush.bf16.msrb.mxu2 %v2440_v62  ;;  %v2477_v62 = vld [vmem:[#allocation5 + $0x1c8] sm:$0xf0] }
  0xf9   : > { %v633_v6 = vpop.f32.mrf.mxu3  ;;  %v605_v41 = vadd.f32 %v604_v2, %v3502_v16  ;;  %v2435_v2 = vld [vmem:[#allocation5 + $0x170] sm:$0xf] }
  0xfa   : > { %v596_v7 = vpop.f32.mrf.mxu0 }
  0xfb   : > { %v597_v8 = vadd.f32 %v596_v7, %v3502_v16  ;;  %v634_v44 = vadd.f32 %v633_v6, %v605_v41  ;;  %v2504_v6 = vor.u32 %v2798_v61, %v2501_v1  ;;  %v2436_v7 = vor.u32 %v2783_v3, %v2435_v2  ;;  %v2493_v41 = vld [vmem:[#allocation5 + $0x1e8] sm:$0xf0]  ;;  %v2792_v61 = vld [vmem:[#allocation5 + $0x1c4] sm:$0xf]  ;;  %v2411_v3 = vld [vmem:[#allocation5 + $0x140] sm:$0xf] }
  0xfc   : > { %v625_v9 = vpop.f32.mrf.mxu1  ;;  %v2480_v2 = vor.u32 %v2792_v61, %v2477_v62  ;;  %v2785_v62 = vld [vmem:[#allocation5 + $0x184] sm:$0xf0] }
  0xfd   : > { %v626_v11 = vadd.f32 %v625_v9, %v597_v8  ;;  %v708_v45 = vmax.f32 %v634_v44, 0.0  ;;  %1361 = vmatpush.bf16.msrb.mxu3 %v2504_v6  ;;  %1274 = vmatpush.bf16.msra.mxu0 %v2436_v7  ;;  %v2491_v44 = vld [vmem:[#allocation5 + $0x1e0] sm:$0xf]  ;;  %v2777_v6 = vld [vmem:[#allocation5 + $0x144] sm:$0xf0] }
  0xfe   : > { %v2412_v7 = vor.u32 %v2777_v6, %v2411_v3  ;;  %v752_v6 = vld [vmem:[#allocation10] sm:$0x3] }
  0xff   : > { %v702_v12 = vmax.f32 %v626_v11, 0.0 }
 0x100   : > { %v606_v13 = vpop.f32.mrf.mxu2 }
 0x101   : > { %v635_v5 = vpop.f32.mrf.mxu3  ;;  %v714_v14 = vpack.c.bf16 %v702_v12, %v700_v10  ;;  %v607_v27 = vadd.f32 %v606_v13, %v3502_v16 }
 0x103   : > { %931 = vmatmul.bf16.gmra.mxu0 %v714_v14  ;;  %989 = vmatmul.bf16.gmra.mxu2 %v714_v14  ;;  %v636_v0 = vadd.f32 %v635_v5, %v607_v27 }
 0x105   : > { %v710_v4 = vmax.f32 %v636_v0, 0.0  ;;  %v2781_v0 = vld [vmem:[#allocation5 + $0x164] sm:$0xf0] }
 0x107   : > { %v718_v51 = vpack.c.bf16 %v710_v4, %v708_v45  ;;  %v2797_v4 = vld [vmem:[#allocation5 + $0x1e4] sm:$0xf0] }
 0x108   : > { %v647_v18 = vpop.f32.mrf.mxu2  ;;  %v2492_v45 = vor.u32 %v2797_v4, %v2491_v44  ;;  %v2786_v4 = vld [vmem:[#allocation5 + $0x194] sm:$0xf] }
 0x109   : > { %v676_v23 = vpop.f32.mrf.mxu3  ;;  %v648_v26 = vadd.f32 %v647_v18, %v3511_v22 }
 0x10b   : > { %v677_v32 = vadd.f32 %v676_v23, %v648_v26 }
 0x10d   : > { %v697_v39 = vmax.f32 %v677_v32, 0.0 }
 0x110   : > { %v649_v29 = vpop.f32.mrf.mxu2 }
 0x111   : > { %v650_v34 = vadd.f32 %v649_v29, %v3511_v22  ;;  %v678_v35 = vpop.f32.mrf.mxu3 }
 0x113   : > { %v679_v38 = vadd.f32 %v678_v35, %v650_v34  ;;  %936 = vmatmul.bf16.gmra.mxu0 %v716_v37  ;;  %994 = vmatmul.bf16.gmra.mxu2 %v716_v37  ;;  %v2499_v35 = vld [vmem:[#allocation5 + $0x1f0] sm:$0xf]  ;;  %v2799_v37 = vld [vmem:[#allocation5 + $0x1f4] sm:$0xf0] }
 0x114   : > { %v2500_v27 = vor.u32 %v2799_v37, %v2499_v35  ;;  %v2395_v37 = vld [vmem:[#allocation5 + $0x120] sm:$0xf] }
 0x115   : > { %v699_v63 = vmax.f32 %v679_v38, 0.0  ;;  %v2780_v38 = vld [vmem:[#allocation5 + $0x164] sm:$0xf] }
 0x116   : > { %1303 = vmatpush.bf16.msra.mxu1 %v2500_v27 }
 0x117   : > { %v713_v33 = vpack.c.bf16 %v699_v63, %v697_v39  ;;  %v2429_v39 = vld [vmem:[#allocation5 + $0x168] sm:$0xf0]  ;;  %v2796_v63 = vld [vmem:[#allocation5 + $0x1e4] sm:$0xf] }
 0x118   : > { %v652_v42 = vpop.f32.mrf.mxu2 }
 0x119   : > { %v681_v43 = vpop.f32.mrf.mxu3  ;;  %955 = vmatmul.bf16.vlgmr.msrb.gmra.mxu1 %v713_v33  ;;  %1013 = vmatmul.bf16.vlgmr.msra.gmra.mxu3 %v713_v33  ;;  %v653_v36 = vadd.f32 %v652_v42, %v3511_v22  ;;  %v2432_v33 = vor.u32 %v2780_v38, %v2429_v39  ;;  %v2496_v42 = vor.u32 %v2796_v63, %v2493_v41  ;;  %v2773_v38 = vld [vmem:[#allocation5 + $0x124] sm:$0xf0]  ;;  %v2459_v39 = vld [vmem:[#allocation5 + $0x1a0] sm:$0xf]  ;;  %v2770_v41 = vld [vmem:[#allocation5 + $0x114] sm:$0xf] }
 0x11a   : > { %1304 = vmatpush.bf16.msra.mxu1 %v2492_v45  ;;  %v2396_v27 = vor.u32 %v2773_v38, %v2395_v37  ;;  %v2789_v63 = vld [vmem:[#allocation5 + $0x1a4] sm:$0xf0] }
 0x11b   : > { %v682_v48 = vadd.f32 %v681_v43, %v653_v36  ;;  %1333 = vmatpush.bf16.msrb.mxu2 %v2432_v33  ;;  %1362 = vmatpush.bf16.msrb.mxu3 %v2496_v42  ;;  %v2778_v36 = vld [vmem:[#allocation5 + $0x154] sm:$0xf]  ;;  %v2460_v33 = vor.u32 %v2789_v63, %v2459_v39  ;;  %v2389_v42 = vld [vmem:[#allocation5 + $0x118] sm:$0xf0] }
 0x11d   : > { %v701_v16 = vmax.f32 %v682_v48, 0.0  ;;  %v2794_v48 = vld [vmem:[#allocation5 + $0x1d4] sm:$0xf] }
 0x120   : > { %v654_v40 = vpop.f32.mrf.mxu2 }
 0x121   : > { %v655_v49 = vadd.f32 %v654_v40, %v3511_v22  ;;  %v683_v50 = vpop.f32.mrf.mxu3  ;;  %v2421_v40 = vld [vmem:[#allocation5 + $0x158] sm:$0xf0] }
 0x123   : > { %v684_v52 = vadd.f32 %v683_v50, %v655_v49  ;;  %941 = vmatmul.bf16.gmra.mxu0 %v718_v51  ;;  %999 = vmatmul.bf16.gmra.mxu2 %v718_v51  ;;  %v2485_v49 = vld [vmem:[#allocation5 + $0x1d8] sm:$0xf0]  ;;  %v2424_v50 = vor.u32 %v2778_v36, %v2421_v40  ;;  %v2768_v40 = vld [vmem:[#allocation5 + $0x104] sm:$0xf] }
 0x124   : > { %v2488_v51 = vor.u32 %v2794_v48, %v2485_v49  ;;  %v2453_v36 = vld [vmem:[#allocation5 + $0x198] sm:$0xf0]  ;;  %v2381_v48 = vld [vmem:[#allocation5 + $0x108] sm:$0xf0]  ;;  %v2379_v49 = vld [vmem:[#allocation5 + $0x100] sm:$0xf] }
 0x125   : > { %v703_v53 = vmax.f32 %v684_v52, 0.0  ;;  %1334 = vmatpush.bf16.msrb.mxu2 %v2424_v50  ;;  %v2419_v52 = vld [vmem:[#allocation5 + $0x150] sm:$0xf]  ;;  %v2456_v45 = vor.u32 %v2786_v4, %v2453_v36  ;;  %v2384_v50 = vor.u32 %v2768_v40, %v2381_v48 }
 0x126   : > { %1363 = vmatpush.bf16.msrb.mxu3 %v2488_v51  ;;  %v2769_v51 = vld [vmem:[#allocation5 + $0x104] sm:$0xf0] }
 0x127   : > { %v715_v54 = vpack.c.bf16 %v703_v53, %v701_v16  ;;  %v2779_v16 = vld [vmem:[#allocation5 + $0x154] sm:$0xf0] }
 0x128   : > { %v657_v55 = vpop.f32.mrf.mxu2  ;;  %v2420_v53 = vor.u32 %v2779_v16, %v2419_v52  ;;  %v2451_v16 = vld [vmem:[#allocation5 + $0x190] sm:$0xf] }
 0x129   : > { %v686_v56 = vpop.f32.mrf.mxu3  ;;  %960 = vmatmul.bf16.gmra.mxu1 %v715_v54  ;;  %1018 = vmatmul.bf16.gmra.mxu3 %v715_v54  ;;  %v658_v8 = vadd.f32 %v657_v55, %v3511_v22  ;;  %v2483_v54 = vld [vmem:[#allocation5 + $0x1d0] sm:$0xf]  ;;  %v2795_v55 = vld [vmem:[#allocation5 + $0x1d4] sm:$0xf0] }
 0x12a   : > { %v2484_v57 = vor.u32 %v2795_v55, %v2483_v54  ;;  %1364 = vmatpush.bf16.msrb.mxu3 %v2480_v2  ;;  %v2380_v54 = vor.u32 %v2769_v51, %v2379_v49 }
 0x12b   : > { %v687_v10 = vadd.f32 %v686_v56, %v658_v8  ;;  %v2776_v56 = vld [vmem:[#allocation5 + $0x144] sm:$0xf]  ;;  %v2475_v8 = vld [vmem:[#allocation5 + $0x1c0] sm:$0xf] }
 0x12c   : > { %v2416_v1 = vor.u32 %v2776_v56, %v2413_v60  ;;  %1305 = vmatpush.bf16.msra.mxu1 %v2484_v57  ;;  %v2784_v56 = vld [vmem:[#allocation5 + $0x184] sm:$0xf]  ;;  %v2445_v57 = vld [vmem:[#allocation5 + $0x188] sm:$0xf0]  ;;  %v2443_v60 = vld [vmem:[#allocation5 + $0x180] sm:$0xf] }
 0x12d   : > { %v705_v5 = vmax.f32 %v687_v10, 0.0  ;;  %v2774_v10 = vld [vmem:[#allocation5 + $0x134] sm:$0xf]  ;;  %v2448_v61 = vor.u32 %v2784_v56, %v2445_v57  ;;  %v2444_v2 = vor.u32 %v2785_v62, %v2443_v60 }
 0x12e   : > { %1335 = vmatpush.bf16.msrb.mxu2 %v2416_v1 }
 0x130   : > { %v659_v9 = vpop.f32.mrf.mxu2 }
 0x131   : > { %v660_v11 = vadd.f32 %v659_v9, %v3511_v22  ;;  %v688_v12 = vpop.f32.mrf.mxu3  ;;  %v2793_v9 = vld [vmem:[#allocation5 + $0x1c4] sm:$0xf0] }
 0x133   : > { %v689_v13 = vadd.f32 %v688_v12, %v660_v11  ;;  %v2476_v11 = vor.u32 %v2793_v9, %v2475_v8  ;;  %v2405_v12 = vld [vmem:[#allocation5 + $0x138] sm:$0xf0]  ;;  %v3523_v8 = vperm.slane %v752_v6, 0 }
 0x135   : > { %v707_v14 = vmax.f32 %v689_v13, 0.0  ;;  %v2790_v13 = vld [vmem:[#allocation5 + $0x1b4] sm:$0xf]  ;;  %1306 = vmatpush.bf16.msra.mxu1 %v2476_v11 }
 0x137   : > { %v717_v15 = vpack.c.bf16 %v707_v14, %v705_v5  ;;  %v2469_v5 = vld [vmem:[#allocation5 + $0x1b8] sm:$0xf0]  ;;  %v2408_v14 = vor.u32 %v2774_v10, %v2405_v12  ;;  %v3526_v12 = vperm.slane %v752_v6, 1 }
 0x138   : > { %v662_v17 = vpop.f32.mrf.mxu2 }
 0x139   : > { %v691_v18 = vpop.f32.mrf.mxu3  ;;  %965 = vmatmul.bf16.gmra.mxu1 %v717_v15  ;;  %1023 = vmatmul.bf16.gmra.mxu3 %v717_v15  ;;  %v663_v19 = vadd.f32 %v662_v17, %v3511_v22  ;;  %v2472_v15 = vor.u32 %v2790_v13, %v2469_v5  ;;  %v2403_v17 = vld [vmem:[#allocation5 + $0x130] sm:$0xf] }
 0x13a   : > { %1336 = vmatpush.bf16.msrb.mxu2 %v2408_v14 }
 0x13b   : > { %v692_v24 = vadd.f32 %v691_v18, %v663_v19  ;;  %1365 = vmatpush.bf16.msrb.mxu3 %v2472_v15  ;;  %v2775_v18 = vld [vmem:[#allocation5 + $0x134] sm:$0xf0] }
 0x13c   : > { %v2404_v19 = vor.u32 %v2775_v18, %v2403_v17 }
 0x13d   : > { %v709_v29 = vmax.f32 %v692_v24, 0.0  ;;  %v2791_v24 = vld [vmem:[#allocation5 + $0x1b4] sm:$0xf0] }
 0x140   : > { %v664_v23 = vpop.f32.mrf.mxu2 }
 0x141   : > { %v665_v25 = vadd.f32 %v664_v23, %v3511_v22  ;;  %v693_v26 = vpop.f32.mrf.mxu3  ;;  %v2427_v22 = vld [vmem:[#allocation5 + $0x160] sm:$0xf]  ;;  %v2467_v23 = vld [vmem:[#allocation5 + $0x1b0] sm:$0xf] }
 0x142   : > { %v2428_v43 = vor.u32 %v2781_v0, %v2427_v22  ;;  %v2392_v22 = vor.u32 %v2770_v41, %v2389_v42  ;;  %v2387_v0 = vld [vmem:[#allocation5 + $0x110] sm:$0xf] }
 0x143   : > { %v694_v28 = vadd.f32 %v693_v26, %v665_v25  ;;  %v2772_v25 = vld [vmem:[#allocation5 + $0x124] sm:$0xf]  ;;  %v2468_v26 = vor.u32 %v2791_v24, %v2467_v23 }
 0x144   : > { %1275 = vmatpush.bf16.msra.mxu0 %v2428_v43  ;;  %v2771_v43 = vld [vmem:[#allocation5 + $0x114] sm:$0xf0] }
 0x145   : > { %v711_v32 = vmax.f32 %v694_v28, 0.0  ;;  %v2397_v28 = vld [vmem:[#allocation5 + $0x128] sm:$0xf0]  ;;  %1307 = vmatpush.bf16.msra.mxu1 %v2468_v26  ;;  %v2388_v44 = vor.u32 %v2771_v43, %v2387_v0 }
 0x147   : > { %v719_v34 = vpack.c.bf16 %v711_v32, %v709_v29  ;;  %v2788_v29 = vld [vmem:[#allocation5 + $0x1a4] sm:$0xf]  ;;  %v2461_v32 = vld [vmem:[#allocation5 + $0x1a8] sm:$0xf0] }
 0x148   : > { %1276 = vmatpush.bf16.msra.mxu0 %v2420_v53  ;;  %v2464_v35 = vor.u32 %v2788_v29, %v2461_v32  ;;  %v2787_v53 = vld [vmem:[#allocation5 + $0x194] sm:$0xf0] }
 0x149   : > { %970 = vmatmul.bf16.gmra.mxu1 %v719_v34  ;;  %1028 = vmatmul.bf16.gmra.mxu3 %v719_v34  ;;  %v2400_v34 = vor.u32 %v2772_v25, %v2397_v28  ;;  %v2452_v55 = vor.u32 %v2787_v53, %v2451_v16 }
 0x14a   : > { %1366 = vmatpush.bf16.msrb.mxu3 %v2464_v35  ;;  %1308 = vmatpush.bf16.msra.mxu1 %v2460_v33 }
 0x14b   : > { %1337 = vmatpush.bf16.msrb.mxu2 %v2400_v34 }
 0x14c   : > { %1277 = vmatpush.bf16.msra.mxu0 %v2412_v7 }
 0x14e   : > { %1367 = vmatpush.bf16.msrb.mxu3 %v2456_v45  ;;  %1309 = vmatpush.bf16.msra.mxu1 %v2452_v55 }
 0x14f   : > { %1338 = vmatpush.bf16.msrb.mxu2 %v2392_v22 }
 0x150   : > { %1278 = vmatpush.bf16.msra.mxu0 %v2404_v19 }
 0x152   : > { %1368 = vmatpush.bf16.msrb.mxu3 %v2448_v61  ;;  %1310 = vmatpush.bf16.msra.mxu1 %v2444_v2  ;;  %v2565_v2 = vld [vmem:[#allocation8 + $0x178] sm:$0xf0] }
 0x153   : > { %1339 = vmatpush.bf16.msrb.mxu2 %v2384_v50 }
 0x154   : > { %1279 = vmatpush.bf16.msra.mxu0 %v2396_v27 }
 0x158   : > { %1280 = vmatpush.bf16.msra.mxu0 %v2388_v44 }
 0x15c   : > { %1281 = vmatpush.bf16.msra.mxu0 %v2380_v54 }
 0x170   : > { %v927_v52 = vpop.f32.mrf.mxu0 }
 0x171   : > { %v928_v11 = vadd.f32 %v927_v52, %v3523_v8 }
 0x176   : > { %v985_v1 = vpop.f32.mrf.mxu2 }
 0x177   : > { %v986_v18 = vadd.f32 %v985_v1, %v3526_v12  ;;  %v2814_v1 = vld [vmem:[#allocation8 + $0x174] sm:$0xf] }
 0x178   : > { %v929_v3 = vpop.f32.mrf.mxu0 }
 0x179   : > { %v930_v14 = vadd.f32 %v929_v3, %v3523_v8  ;;  %v2830_v3 = vld [vmem:[#allocation8 + $0x1f4] sm:$0xf] }
 0x17e   : > { %v987_v7 = vpop.f32.mrf.mxu2 }
 0x17f   : > { %v988_v28 = vadd.f32 %v987_v7, %v3526_v12 }
 0x180   : > { %v932_v10 = vpop.f32.mrf.mxu0 }
 0x181   : > { %v933_v39 = vadd.f32 %v932_v10, %v3523_v8  ;;  %v2629_v10 = vld [vmem:[#allocation8 + $0x1f8] sm:$0xf0] }
 0x186   : > { %v990_v15 = vpop.f32.mrf.mxu2 }
 0x187   : > { %v991_v43 = vadd.f32 %v990_v15, %v3526_v12 }
 0x188   : > { %v934_v26 = vpop.f32.mrf.mxu0 }
 0x18e   : > { %v992_v27 = vpop.f32.mrf.mxu2 }
 0x18f   : > { %v993_v48 = vadd.f32 %v992_v27, %v3526_v12  ;;  %v2621_v27 = vld [vmem:[#allocation8 + $0x1e8] sm:$0xf0] }
 0x190   : > { %v937_v42 = vpop.f32.mrf.mxu0 }
 0x191   : > { %v938_v55 = vadd.f32 %v937_v42, %v3523_v8 }
 0x196   : > { %v956_v9 = vpop.f32.mrf.mxu1  ;;  %v995_v40 = vpop.f32.mrf.mxu2 }
 0x197   : > { %v957_v13 = vadd.f32 %v956_v9, %v928_v11  ;;  %v996_v6 = vadd.f32 %v995_v40, %v3526_v12  ;;  %v2568_v9 = vor.u32 %v2814_v1, %v2565_v2  ;;  %v2563_v11 = vld [vmem:[#allocation8 + $0x170] sm:$0xf]  ;;  %v2811_v1 = vld [vmem:[#allocation8 + $0x154] sm:$0xf0] }
 0x198   : > { %v939_v53 = vpop.f32.mrf.mxu0 }
 0x199   : > { %v3531_v19 = vadd.f32 %v957_v13, %v3436_v46  ;;  %v2815_v13 = vld [vmem:[#allocation8 + $0x174] sm:$0xf0]  ;;  %1672 = vmatpush.bf16.msra.mxu2 %v2568_v9  ;;  %v2808_v9 = vld [vmem:[#allocation8 + $0x144] sm:$0xf] }
 0x19b   : > { %v1050_v29 = vmax.f32 %v3531_v19, 0.0 }
 0x19c   : > { %v1014_v5 = vpop.f32.mrf.mxu3 }
 0x19d   : > { %v1015_v24 = vadd.f32 %v1014_v5, %v986_v18  ;;  %v2972_v5 = vld [vmem:[%s3417_s1 + $0x40] sm:$0xff]  ;;  %v2564_v18 = vor.u32 %v2815_v13, %v2563_v11 }
 0x19e   : > { %v958_v17 = vpop.f32.mrf.mxu1  ;;  %v997_v61 = vpop.f32.mrf.mxu2 }
 0x19f   : > { %v959_v23 = vadd.f32 %v958_v17, %v930_v14  ;;  %v3540_v35 = vadd.f32 %v1015_v24, %v3446_v58  ;;  %v2632_v17 = vor.u32 %v2830_v3, %v2629_v10  ;;  %v2831_v24 = vld [vmem:[#allocation8 + $0x1f4] sm:$0xf0]  ;;  %1614 = vmatpush.bf16.msrb.mxu0 %v2564_v18  ;;  %v998_v40 = vadd.f32 %v997_v61, %v3526_v12 }
 0x1a0   : > { %v2975_v18 = vld [vmem:[%s3417_s1 + $0x58] sm:$0xff] }
 0x1a1   : > { %v3534_v25 = vadd.f32 %v959_v23, %v3439_v47  ;;  %v1051_v63 = vmax.f32 %v3540_v35, 0.0  ;;  %v2627_v23 = vld [vmem:[#allocation8 + $0x1f0] sm:$0xf]  ;;  %1701 = vmatpush.bf16.msra.mxu3 %v2632_v17  ;;  %v2824_v17 = vld [vmem:[#allocation8 + $0x1c4] sm:$0xf] }
 0x1a3   : > { %v1052_v32 = vmax.f32 %v3534_v25, 0.0 }
 0x1a4   : > { %v1016_v34 = vpop.f32.mrf.mxu3 }
 0x1a5   : > { %v1066_v46 = vpack.c.bf16 %v1052_v32, %v1050_v29  ;;  %v1017_v37 = vadd.f32 %v1016_v34, %v988_v28  ;;  %v942_v28 = vpop.f32.mrf.mxu0 }
 0x1a6   : > { %v961_v38 = vpop.f32.mrf.mxu1  ;;  %v1000_v10 = vpop.f32.mrf.mxu2 }
 0x1a7   : > { %v3547_v47 = vadd.f32 %v1017_v37, %v3449_v59  ;;  %1282 = vmatmul.bf16.vlgmr.msra.gmra.mxu0 %v1066_v46  ;;  %1340 = vmatmul.bf16.vlgmr.msrb.gmra.mxu2 %v1066_v46  ;;  %v962_v33 = vadd.f32 %v961_v38, %v933_v39  ;;  %v935_v59 = vadd.f32 %v934_v26, %v3523_v8  ;;  %v2812_v26 = vld [vmem:[#allocation8 + $0x164] sm:$0xf]  ;;  %v2557_v37 = vld [vmem:[#allocation8 + $0x168] sm:$0xf0] }
 0x1a8   : > { %v2628_v46 = vor.u32 %v2831_v24, %v2627_v23  ;;  %v2828_v38 = vld [vmem:[#allocation8 + $0x1e4] sm:$0xf]  ;;  %v2973_v39 = vld [vmem:[%s3417_s1 + $0x50] sm:$0xff] }
 0x1a9   : > { %v1053_v58 = vmax.f32 %v3547_v47, 0.0  ;;  %v3559_v44 = vadd.f32 %v962_v33, %v3468_v20  ;;  %v2560_v33 = vor.u32 %v2812_v26, %v2557_v37  ;;  %v2624_v42 = vor.u32 %v2828_v38, %v2621_v27  ;;  %v2605_v24 = vld [vmem:[#allocation8 + $0x1c8] sm:$0xf0]  ;;  %v2539_v26 = vld [vmem:[#allocation8 + $0x140] sm:$0xf] }
 0x1aa   : > { %1643 = vmatpush.bf16.msrb.mxu1 %v2628_v46  ;;  %v2603_v37 = vld [vmem:[#allocation8 + $0x1c0] sm:$0xf]  ;;  %v2825_v38 = vld [vmem:[#allocation8 + $0x1c4] sm:$0xf0]  ;;  %v943_v27 = vadd.f32 %v942_v28, %v3523_v8 }
 0x1ab   : > { %v1067_v41 = vpack.c.bf16 %v1053_v58, %v1051_v63  ;;  %v1054_v49 = vmax.f32 %v3559_v44, 0.0  ;;  %1673 = vmatpush.bf16.msra.mxu2 %v2560_v33  ;;  %1702 = vmatpush.bf16.msra.mxu3 %v2624_v42  ;;  %v2806_v42 = vld [vmem:[#allocation8 + $0x134] sm:$0xf]  ;;  %v2604_v28 = vor.u32 %v2825_v38, %v2603_v37 }
 0x1ac   : > { %v1019_v22 = vpop.f32.mrf.mxu3 }
 0x1ad   : > { %1311 = vmatmul.bf16.vlgmr.msra.gmra.mxu1 %v1067_v41  ;;  %1369 = vmatmul.bf16.vlgmr.msrb.gmra.mxu3 %v1067_v41  ;;  %v1020_v36 = vadd.f32 %v1019_v22, %v991_v43  ;;  %v2555_v22 = vld [vmem:[#allocation8 + $0x160] sm:$0xf] }
 0x1ae   : > { %v963_v0 = vpop.f32.mrf.mxu1  ;;  %v2619_v43 = vld [vmem:[#allocation8 + $0x1e0] sm:$0xf] }
 0x1af   : > { %v964_v4 = vadd.f32 %v963_v0, %v935_v59  ;;  %v3568_v52 = vadd.f32 %v1020_v36, %v3478_v30  ;;  %v2813_v59 = vld [vmem:[#allocation8 + $0x164] sm:$0xf0]  ;;  %v2810_v36 = vld [vmem:[#allocation8 + $0x154] sm:$0xf] }
 0x1b0   : > { %v2556_v0 = vor.u32 %v2813_v59, %v2555_v22  ;;  %v2533_v22 = vld [vmem:[#allocation8 + $0x138] sm:$0xf0]  ;;  %v944_v59 = vpop.f32.mrf.mxu0 }
 0x1b1   : > { %v3562_v45 = vadd.f32 %v964_v4, %v3471_v21  ;;  %v1055_v56 = vmax.f32 %v3568_v52, 0.0  ;;  %v2829_v4 = vld [vmem:[#allocation8 + $0x1e4] sm:$0xf0] }
 0x1b2   : > { %1615 = vmatpush.bf16.msrb.mxu0 %v2556_v0  ;;  %v2608_v0 = vor.u32 %v2824_v17, %v2605_v24  ;;  %v2978_v17 = vld [vmem:[%s3417_s1 + $0x68] sm:$0xff] }
 0x1b3   : > { %v1056_v50 = vmax.f32 %v3562_v45, 0.0 }
 0x1b4   : > { %v1021_v51 = vpop.f32.mrf.mxu3 }
 0x1b5   : > { %v1022_v16 = vadd.f32 %v1021_v51, %v993_v48  ;;  %v1068_v20 = vpack.c.bf16 %v1056_v50, %v1054_v49 }
 0x1b6   : > { %v966_v21 = vpop.f32.mrf.mxu1 }
 0x1b7   : > { %v3575_v54 = vadd.f32 %v1022_v16, %v3481_v31  ;;  %1287 = vmatmul.bf16.gmra.mxu0 %v1068_v20  ;;  %1345 = vmatmul.bf16.gmra.mxu2 %v1068_v20  ;;  %v967_v57 = vadd.f32 %v966_v21, %v938_v55  ;;  %v940_v31 = vadd.f32 %v939_v53, %v3523_v8  ;;  %v2549_v20 = vld [vmem:[#allocation8 + $0x158] sm:$0xf0]  ;;  %v2826_v53 = vld [vmem:[#allocation8 + $0x1d4] sm:$0xf]  ;;  %v2974_v21 = vld [vmem:[%s3417_s1 + $0x48] sm:$0xff] }
 0x1b8   : > { %v2620_v16 = vor.u32 %v2829_v4, %v2619_v43  ;;  %v2822_v4 = vld [vmem:[#allocation8 + $0x1b4] sm:$0xf] }
 0x1b9   : > { %v1057_v30 = vmax.f32 %v3575_v54, 0.0  ;;  %v3587_v14 = vadd.f32 %v2972_v5, %v967_v57 }
 0x1ba   : > { %1644 = vmatpush.bf16.msrb.mxu1 %v2620_v16  ;;  %v2597_v16 = vld [vmem:[#allocation8 + $0x1b8] sm:$0xf0] }
 0x1bb   : > { %v1069_v60 = vpack.c.bf16 %v1057_v30, %v1055_v56  ;;  %v1058_v48 = vmax.f32 %v3587_v14, 0.0 }
 0x1bc   : > { %v1024_v62 = vpop.f32.mrf.mxu3 }
 0x1bd   : > { %1316 = vmatmul.bf16.gmra.mxu1 %v1069_v60  ;;  %1374 = vmatmul.bf16.gmra.mxu3 %v1069_v60  ;;  %v1025_v34 = vadd.f32 %v1024_v62, %v996_v6  ;;  %v2552_v60 = vor.u32 %v2810_v36, %v2549_v20  ;;  %v2613_v62 = vld [vmem:[#allocation8 + $0x1d8] sm:$0xf0]  ;;  %v2611_v6 = vld [vmem:[#allocation8 + $0x1d0] sm:$0xf] }
 0x1be   : > { %v968_v7 = vpop.f32.mrf.mxu1  ;;  %v2616_v3 = vor.u32 %v2826_v53, %v2613_v62  ;;  %v2531_v20 = vld [vmem:[#allocation8 + $0x130] sm:$0xf]  ;;  %v2807_v53 = vld [vmem:[#allocation8 + $0x134] sm:$0xf0] }
 0x1bf   : > { %v969_v15 = vadd.f32 %v968_v7, %v940_v31  ;;  %v3596_v55 = vadd.f32 %v2974_v21, %v1025_v34  ;;  %v2547_v31 = vld [vmem:[#allocation8 + $0x150] sm:$0xf]  ;;  %v2827_v7 = vld [vmem:[#allocation8 + $0x1d4] sm:$0xf0]  ;;  %v2809_v34 = vld [vmem:[#allocation8 + $0x144] sm:$0xf0]  ;;  %1674 = vmatpush.bf16.msra.mxu2 %v2552_v60  ;;  %v945_v60 = vadd.f32 %v944_v59, %v3523_v8 }
 0x1c0   : > { %v2548_v13 = vor.u32 %v2811_v1, %v2547_v31  ;;  %v2612_v5 = vor.u32 %v2827_v7, %v2611_v6  ;;  %1703 = vmatpush.bf16.msra.mxu3 %v2616_v3  ;;  %v2540_v43 = vor.u32 %v2809_v34, %v2539_v26  ;;  %v2600_v31 = vor.u32 %v2822_v4, %v2597_v16  ;;  %v1002_v7 = vpop.f32.mrf.mxu2  ;;  %v2979_v34 = vld [vmem:[%s3417_s1 + $0x78] sm:$0xff]  ;;  %v2589_v4 = vld [vmem:[#allocation8 + $0x1a8] sm:$0xf0]  ;;  %v2805_v16 = vld [vmem:[#allocation8 + $0x124] sm:$0xf0] }
 0x1c1   : > { %v3590_v41 = vadd.f32 %v2973_v39, %v969_v15  ;;  %v2541_v15 = vld [vmem:[#allocation8 + $0x148] sm:$0xf0]  ;;  %v1059_v39 = vmax.f32 %v3596_v55, 0.0  ;;  %v2532_v1 = vor.u32 %v2807_v53, %v2531_v20  ;;  %v2587_v53 = vld [vmem:[#allocation8 + $0x1a0] sm:$0xf] }
 0x1c2   : > { %v2544_v46 = vor.u32 %v2808_v9, %v2541_v15  ;;  %1616 = vmatpush.bf16.msrb.mxu0 %v2548_v13  ;;  %1645 = vmatpush.bf16.msrb.mxu1 %v2612_v5  ;;  %v2977_v9 = vld [vmem:[%s3417_s1 + $0x70] sm:$0xff]  ;;  %v1003_v13 = vadd.f32 %v1002_v7, %v3526_v12  ;;  %v2803_v7 = vld [vmem:[#allocation8 + $0x114] sm:$0xf0] }
 0x1c3   : > { %v1060_v51 = vmax.f32 %v3590_v41, 0.0 }
 0x1c4   : > { %v1026_v57 = vpop.f32.mrf.mxu3  ;;  %1675 = vmatpush.bf16.msra.mxu2 %v2544_v46  ;;  %1704 = vmatpush.bf16.msra.mxu3 %v2608_v0  ;;  %v2525_v0 = vld [vmem:[#allocation8 + $0x128] sm:$0xf0] }
 0x1c5   : > { %v1027_v2 = vadd.f32 %v1026_v57, %v998_v40  ;;  %v1070_v61 = vpack.c.bf16 %v1060_v51, %v1058_v48  ;;  %v2536_v57 = vor.u32 %v2806_v42, %v2533_v22  ;;  %v2823_v42 = vld [vmem:[#allocation8 + $0x1b4] sm:$0xf0]  ;;  %v2804_v22 = vld [vmem:[#allocation8 + $0x124] sm:$0xf] }
 0x1c6   : > { %v971_v11 = vpop.f32.mrf.mxu1  ;;  %1617 = vmatpush.bf16.msrb.mxu0 %v2540_v43  ;;  %1646 = vmatpush.bf16.msrb.mxu1 %v2604_v28  ;;  %v2820_v43 = vld [vmem:[#allocation8 + $0x1a4] sm:$0xf]  ;;  %v2523_v28 = vld [vmem:[#allocation8 + $0x120] sm:$0xf] }
 0x1c7   : > { %v3603_v23 = vadd.f32 %v2975_v18, %v1027_v2  ;;  %1292 = vmatmul.bf16.gmra.mxu0 %v1070_v61  ;;  %1350 = vmatmul.bf16.gmra.mxu2 %v1070_v61  ;;  %v972_v36 = vadd.f32 %v971_v11, %v943_v27  ;;  %v1001_v2 = vadd.f32 %v1000_v10, %v3526_v12  ;;  %v2976_v61 = vld [vmem:[%s3417_s1 + $0x60] sm:$0xff]  ;;  %v2595_v27 = vld [vmem:[#allocation8 + $0x1b0] sm:$0xf] }
 0x1c8   : > { %1676 = vmatpush.bf16.msra.mxu2 %v2536_v57  ;;  %1705 = vmatpush.bf16.msra.mxu3 %v2600_v31  ;;  %v2596_v59 = vor.u32 %v2823_v42, %v2595_v27  ;;  %v2524_v20 = vor.u32 %v2805_v16, %v2523_v28  ;;  %v2802_v57 = vld [vmem:[#allocation8 + $0x114] sm:$0xf]  ;;  %v2816_v42 = vld [vmem:[#allocation8 + $0x184] sm:$0xf] }
 0x1c9   : > { %v1061_v33 = vmax.f32 %v3603_v23, 0.0  ;;  %v3615_v3 = vadd.f32 %v2976_v61, %v972_v36  ;;  %v2528_v36 = vor.u32 %v2804_v22, %v2525_v0  ;;  %v2818_v31 = vld [vmem:[#allocation8 + $0x194] sm:$0xf]  ;;  %v2573_v22 = vld [vmem:[#allocation8 + $0x188] sm:$0xf0] }
 0x1ca   : > { %1618 = vmatpush.bf16.msrb.mxu0 %v2532_v1  ;;  %1647 = vmatpush.bf16.msrb.mxu1 %v2596_v59  ;;  %v2581_v1 = vld [vmem:[#allocation8 + $0x198] sm:$0xf0]  ;;  %v2576_v59 = vor.u32 %v2816_v42, %v2573_v22  ;;  %v2571_v0 = vld [vmem:[#allocation8 + $0x180] sm:$0xf] }
 0x1cb   : > { %v1071_v40 = vpack.c.bf16 %v1061_v33, %v1059_v39  ;;  %v1062_v5 = vmax.f32 %v3615_v3, 0.0  ;;  %v2584_v61 = vor.u32 %v2818_v31, %v2581_v1 }
 0x1cc   : > { %v1029_v21 = vpop.f32.mrf.mxu3  ;;  %1677 = vmatpush.bf16.msra.mxu2 %v2528_v36 }
 0x1cd   : > { %1321 = vmatmul.bf16.gmra.mxu1 %v1071_v40  ;;  %1379 = vmatmul.bf16.gmra.mxu3 %v1071_v40  ;;  %v1030_v8 = vadd.f32 %v1029_v21, %v1001_v2  ;;  %v2592_v40 = vor.u32 %v2820_v43, %v2589_v4  ;;  %v2821_v21 = vld [vmem:[#allocation8 + $0x1a4] sm:$0xf0] }
 0x1ce   : > { %v973_v62 = vpop.f32.mrf.mxu1  ;;  %1619 = vmatpush.bf16.msrb.mxu0 %v2524_v20  ;;  %v2817_v43 = vld [vmem:[#allocation8 + $0x184] sm:$0xf0] }
 0x1cf   : > { %v974_v6 = vadd.f32 %v973_v62, %v945_v60  ;;  %v3624_v18 = vadd.f32 %v2978_v17, %v1030_v8  ;;  %1706 = vmatpush.bf16.msra.mxu3 %v2592_v40  ;;  %v2588_v60 = vor.u32 %v2821_v21, %v2587_v53  ;;  %v2517_v62 = vld [vmem:[#allocation8 + $0x118] sm:$0xf0]  ;;  %v2572_v4 = vor.u32 %v2817_v43, %v2571_v0 }
 0x1d0   : > { %v2520_v2 = vor.u32 %v2802_v57, %v2517_v62  ;;  %v1108_v40 = vld [vmem:[#allocation7 + $0x2] sm:$0x3] }
 0x1d1   : > { %v3618_v11 = vadd.f32 %v2977_v9, %v974_v6  ;;  %v1063_v12 = vmax.f32 %v3624_v18, 0.0  ;;  %1648 = vmatpush.bf16.msrb.mxu1 %v2588_v60  ;;  %v2515_v6 = vld [vmem:[#allocation8 + $0x110] sm:$0xf]  ;;  %v2800_v9 = vld [vmem:[#allocation8 + $0x104] sm:$0xf]  ;;  %v3639_v20 = vperm.slane %v1108_v40, 0 }
 0x1d2   : > { %1678 = vmatpush.bf16.msra.mxu2 %v2520_v2  ;;  %v2516_v8 = vor.u32 %v2803_v7, %v2515_v6  ;;  %v3642_v62 = vperm.slane %v1108_v40, 1 }
 0x1d3   : > { %v1064_v10 = vmax.f32 %v3618_v11, 0.0  ;;  %1707 = vmatpush.bf16.msra.mxu3 %v2584_v61 }
 0x1d4   : > { %v1031_v15 = vpop.f32.mrf.mxu3  ;;  %1620 = vmatpush.bf16.msrb.mxu0 %v2516_v8 }
 0x1d5   : > { %v1032_v24 = vadd.f32 %v1031_v15, %v1003_v13  ;;  %v1072_v26 = vpack.c.bf16 %v1064_v10, %v1062_v5  ;;  %v2509_v13 = vld [vmem:[#allocation8 + $0x108] sm:$0xf0]  ;;  %v2507_v15 = vld [vmem:[#allocation8 + $0x100] sm:$0xf] }
 0x1d6   : > { %v2512_v17 = vor.u32 %v2800_v9, %v2509_v13 }
 0x1d7   : > { %v3631_v46 = vadd.f32 %v2979_v34, %v1032_v24  ;;  %1297 = vmatmul.bf16.gmra.mxu0 %v1072_v26  ;;  %1355 = vmatmul.bf16.gmra.mxu2 %v1072_v26  ;;  %v2801_v24 = vld [vmem:[#allocation8 + $0x104] sm:$0xf0]  ;;  %v2579_v26 = vld [vmem:[#allocation8 + $0x190] sm:$0xf]  ;;  %v2819_v34 = vld [vmem:[#allocation8 + $0x194] sm:$0xf0] }
 0x1d8   : > { %v2580_v27 = vor.u32 %v2819_v34, %v2579_v26  ;;  %1679 = vmatpush.bf16.msra.mxu2 %v2512_v17  ;;  %1708 = vmatpush.bf16.msra.mxu3 %v2576_v59 }
 0x1d9   : > { %v1065_v37 = vmax.f32 %v3631_v46, 0.0 }
 0x1da   : > { %1649 = vmatpush.bf16.msrb.mxu1 %v2580_v27 }
 0x1db   : > { %v1073_v38 = vpack.c.bf16 %v1065_v37, %v1063_v12 }
 0x1dd   : > { %1326 = vmatmul.bf16.gmra.mxu1 %v1073_v38  ;;  %1384 = vmatmul.bf16.gmra.mxu3 %v1073_v38  ;;  %v2508_v38 = vor.u32 %v2801_v24, %v2507_v15 }
 0x1de   : > { %1650 = vmatpush.bf16.msrb.mxu1 %v2572_v4 }
 0x1df   : > { %1621 = vmatpush.bf16.msrb.mxu0 %v2508_v38 }
 0x224   : > { %v1283_v36 = vpop.f32.mrf.mxu0 }
 0x225   : > { %v1284_v21 = vadd.f32 %v1283_v36, %v3639_v20 }
 0x22a   : > { %v1312_v28 = vpop.f32.mrf.mxu1  ;;  %v1341_v16 = vpop.f32.mrf.mxu2 }
 0x22b   : > { %v1313_v60 = vadd.f32 %v1312_v28, %v1284_v21  ;;  %v1342_v8 = vadd.f32 %v1341_v16, %v3642_v62 }
 0x22c   : > { %v1285_v53 = vpop.f32.mrf.mxu0 }
 0x22d   : > { %v1286_v31 = vadd.f32 %v1285_v53, %v3639_v20  ;;  %v1390_v7 = vmax.f32 %v1313_v60, 0.0 }
 0x230   : > { %v1370_v57 = vpop.f32.mrf.mxu3 }
 0x231   : > { %v1371_v13 = vadd.f32 %v1370_v57, %v1342_v8 }
 0x232   : > { %v1314_v1 = vpop.f32.mrf.mxu1  ;;  %v1343_v2 = vpop.f32.mrf.mxu2 }
 0x233   : > { %v1315_v61 = vadd.f32 %v1314_v1, %v1286_v31  ;;  %v1344_v17 = vadd.f32 %v1343_v2, %v3642_v62  ;;  %v1391_v27 = vmax.f32 %v1371_v13, 0.0 }
 0x234   : > { %v1288_v6 = vpop.f32.mrf.mxu0 }
 0x235   : > { %v1392_v9 = vmax.f32 %v1315_v61, 0.0  ;;  %v1289_v0 = vadd.f32 %v1288_v6, %v3639_v20 }
 0x237   : > { %v1406_v15 = vpack.c.bf16 %v1392_v9, %v1390_v7 }
 0x238   : > { %v1372_v24 = vpop.f32.mrf.mxu3 }
 0x239   : > { %v1373_v26 = vadd.f32 %v1372_v24, %v1344_v17  ;;  %1622 = vmatmul.bf16.vlgmr.msrb.gmra.mxu0 %v1406_v15  ;;  %1680 = vmatmul.bf16.vlgmr.msra.gmra.mxu2 %v1406_v15 }
 0x23a   : > { %v1317_v34 = vpop.f32.mrf.mxu1  ;;  %v1346_v38 = vpop.f32.mrf.mxu2 }
 0x23b   : > { %v1393_v42 = vmax.f32 %v1373_v26, 0.0  ;;  %v1318_v4 = vadd.f32 %v1317_v34, %v1289_v0  ;;  %v1347_v57 = vadd.f32 %v1346_v38, %v3642_v62  ;;  %v2839_v26 = vld [vmem:[#allocation11 + $0x38] sm:$0xff] }
 0x23c   : > { %v1290_v22 = vpop.f32.mrf.mxu0  ;;  %v2847_v34 = vld [vmem:[#allocation11 + $0x78] sm:$0xff]  ;;  %1898 = vmatpush.bf16.msra.mxu0 %v2839_v26 }
 0x23d   : > { %v1407_v59 = vpack.c.bf16 %v1393_v42, %v1391_v27  ;;  %v1291_v36 = vadd.f32 %v1290_v22, %v3639_v20  ;;  %v1394_v21 = vmax.f32 %v1318_v4, 0.0  ;;  %1927 = vmatpush.bf16.msra.mxu1 %v2847_v34  ;;  %v2838_v22 = vld [vmem:[#allocation11 + $0x30] sm:$0xff]  ;;  %v2843_v26 = vld [vmem:[#allocation11 + $0x58] sm:$0xff] }
 0x23f   : > { %1651 = vmatmul.bf16.vlgmr.msrb.gmra.mxu1 %v1407_v59  ;;  %1709 = vmatmul.bf16.vlgmr.msra.gmra.mxu3 %v1407_v59  ;;  %v2846_v59 = vld [vmem:[#allocation11 + $0x70] sm:$0xff] }
 0x240   : > { %v1375_v43 = vpop.f32.mrf.mxu3  ;;  %1899 = vmatpush.bf16.msra.mxu0 %v2838_v22 }
 0x241   : > { %v1376_v31 = vadd.f32 %v1375_v43, %v1347_v57  ;;  %1928 = vmatpush.bf16.msra.mxu1 %v2846_v59 }
 0x242   : > { %v1319_v40 = vpop.f32.mrf.mxu1  ;;  %v1348_v28 = vpop.f32.mrf.mxu2 }
 0x243   : > { %v1320_v16 = vadd.f32 %v1319_v40, %v1291_v36  ;;  %v1349_v1 = vadd.f32 %v1348_v28, %v3642_v62  ;;  %v1395_v9 = vmax.f32 %v1376_v31, 0.0 }
 0x244   : > { %v1293_v53 = vpop.f32.mrf.mxu0 }
 0x245   : > { %v1396_v60 = vmax.f32 %v1320_v16, 0.0  ;;  %v1294_v24 = vadd.f32 %v1293_v53, %v3639_v20  ;;  %v2837_v53 = vld [vmem:[#allocation11 + $0x28] sm:$0xff] }
 0x246   : > { %1900 = vmatpush.bf16.msra.mxu0 %v2837_v53 }
 0x247   : > { %v1408_v2 = vpack.c.bf16 %v1396_v60, %v1394_v21  ;;  %v2845_v21 = vld [vmem:[#allocation11 + $0x68] sm:$0xff] }
 0x248   : > { %v1377_v61 = vpop.f32.mrf.mxu3  ;;  %1929 = vmatpush.bf16.msra.mxu1 %v2845_v21 }
 0x249   : > { %v1378_v6 = vadd.f32 %v1377_v61, %v1349_v1  ;;  %1627 = vmatmul.bf16.gmra.mxu0 %v1408_v2  ;;  %1685 = vmatmul.bf16.gmra.mxu2 %v1408_v2 }
 0x24a   : > { %v1322_v7 = vpop.f32.mrf.mxu1  ;;  %v1351_v8 = vpop.f32.mrf.mxu2 }
 0x24b   : > { %v1397_v13 = vmax.f32 %v1378_v6, 0.0  ;;  %v1323_v27 = vadd.f32 %v1322_v7, %v1294_v24  ;;  %v1352_v28 = vadd.f32 %v1351_v8, %v3642_v62  ;;  %v2836_v7 = vld [vmem:[#allocation11 + $0x20] sm:$0xff]  ;;  %v2835_v24 = vld [vmem:[#allocation11 + $0x18] sm:$0xff] }
 0x24c   : > { %v1295_v15 = vpop.f32.mrf.mxu0  ;;  %1901 = vmatpush.bf16.msra.mxu0 %v2836_v7 }
 0x24d   : > { %v1409_v17 = vpack.c.bf16 %v1397_v13, %v1395_v9  ;;  %v1296_v42 = vadd.f32 %v1295_v15, %v3639_v20  ;;  %v1398_v40 = vmax.f32 %v1323_v27, 0.0  ;;  %v2844_v9 = vld [vmem:[#allocation11 + $0x60] sm:$0xff] }
 0x24e   : > { %1930 = vmatpush.bf16.msra.mxu1 %v2844_v9  ;;  %v1448_v9 = vld [vmem:[#allocation10 + $0x2] sm:$0x3] }
 0x24f   : > { %1656 = vmatmul.bf16.gmra.mxu1 %v1409_v17  ;;  %1714 = vmatmul.bf16.gmra.mxu3 %v1409_v17 }
 0x250   : > { %v1380_v38 = vpop.f32.mrf.mxu3  ;;  %1902 = vmatpush.bf16.msra.mxu0 %v2835_v24 }
 0x251   : > { %v1381_v57 = vadd.f32 %v1380_v38, %v1352_v28 }
 0x252   : > { %v1324_v0 = vpop.f32.mrf.mxu1  ;;  %v1353_v43 = vpop.f32.mrf.mxu2  ;;  %1931 = vmatpush.bf16.msra.mxu1 %v2843_v26 }
 0x253   : > { %v1325_v4 = vadd.f32 %v1324_v0, %v1296_v42  ;;  %v1354_v31 = vadd.f32 %v1353_v43, %v3642_v62  ;;  %v1399_v8 = vmax.f32 %v1381_v57, 0.0 }
 0x254   : > { %v1298_v36 = vpop.f32.mrf.mxu0 }
 0x255   : > { %v1400_v16 = vmax.f32 %v1325_v4, 0.0  ;;  %v1299_v34 = vadd.f32 %v1298_v36, %v3639_v20 }
 0x257   : > { %v1410_v60 = vpack.c.bf16 %v1400_v16, %v1398_v40 }
 0x258   : > { %v1382_v1 = vpop.f32.mrf.mxu3 }
 0x259   : > { %v1383_v2 = vadd.f32 %v1382_v1, %v1354_v31  ;;  %1632 = vmatmul.bf16.gmra.mxu0 %v1410_v60  ;;  %1690 = vmatmul.bf16.gmra.mxu2 %v1410_v60  ;;  %v2834_v31 = vld [vmem:[#allocation11 + $0x10] sm:$0xff] }
 0x25a   : > { %v1327_v61 = vpop.f32.mrf.mxu1  ;;  %v1356_v6 = vpop.f32.mrf.mxu2  ;;  %v2842_v1 = vld [vmem:[#allocation11 + $0x50] sm:$0xff]  ;;  %1903 = vmatpush.bf16.msra.mxu0 %v2834_v31 }
 0x25b   : > { %v1401_v13 = vmax.f32 %v1383_v2, 0.0  ;;  %v1328_v27 = vadd.f32 %v1327_v61, %v1299_v34  ;;  %v1357_v4 = vadd.f32 %v1356_v6, %v3642_v62  ;;  %1932 = vmatpush.bf16.msra.mxu1 %v2842_v1  ;;  %v2833_v2 = vld [vmem:[#allocation11 + $0x8] sm:$0xff]  ;;  %v2832_v6 = vld [vmem:[#allocation11] sm:$0xff]  ;;  %v3662_v34 = vperm.slane %v1448_v9, 1 }
 0x25c   : > { %v1300_v17 = vpop.f32.mrf.mxu0  ;;  %v2841_v61 = vld [vmem:[#allocation11 + $0x48] sm:$0xff] }
 0x25d   : > { %v1411_v15 = vpack.c.bf16 %v1401_v13, %v1399_v8  ;;  %v1301_v42 = vadd.f32 %v1300_v17, %v3639_v20  ;;  %v1402_v43 = vmax.f32 %v1328_v27, 0.0  ;;  %v3659_v8 = vperm.slane %v1448_v9, 0 }
 0x25e   : > { %1904 = vmatpush.bf16.msra.mxu0 %v2833_v2 }
 0x25f   : > { %1661 = vmatmul.bf16.gmra.mxu1 %v1411_v15  ;;  %1719 = vmatmul.bf16.gmra.mxu3 %v1411_v15 }
 0x260   : > { %v1385_v38 = vpop.f32.mrf.mxu3  ;;  %1933 = vmatpush.bf16.msra.mxu1 %v2841_v61 }
 0x261   : > { %v1386_v28 = vadd.f32 %v1385_v38, %v1357_v4 }
 0x262   : > { %v1329_v22 = vpop.f32.mrf.mxu1  ;;  %v1358_v0 = vpop.f32.mrf.mxu2  ;;  %1905 = vmatpush.bf16.msra.mxu0 %v2832_v6 }
 0x263   : > { %v1330_v59 = vadd.f32 %v1329_v22, %v1301_v42  ;;  %v1359_v53 = vadd.f32 %v1358_v0, %v3642_v62  ;;  %v1403_v57 = vmax.f32 %v1386_v28, 0.0  ;;  %v2840_v62 = vld [vmem:[#allocation11 + $0x40] sm:$0xff] }
 0x264   : > { %1934 = vmatpush.bf16.msra.mxu1 %v2840_v62 }
 0x265   : > { %v1404_v40 = vmax.f32 %v1330_v59, 0.0 }
 0x267   : > { %v1412_v16 = vpack.c.bf16 %v1404_v40, %v1402_v43 }
 0x268   : > { %v1387_v36 = vpop.f32.mrf.mxu3 }
 0x269   : > { %v1388_v21 = vadd.f32 %v1387_v36, %v1359_v53  ;;  %1637 = vmatmul.bf16.gmra.mxu0 %v1412_v16  ;;  %1695 = vmatmul.bf16.gmra.mxu2 %v1412_v16 }
 0x26b   : > { %v1405_v60 = vmax.f32 %v1388_v21, 0.0 }
 0x26d   : > { %v1413_v20 = vpack.c.bf16 %v1405_v60, %v1403_v57 }
 0x26f   : > { %1666 = vmatmul.bf16.gmra.mxu1 %v1413_v20  ;;  %1724 = vmatmul.bf16.gmra.mxu3 %v1413_v20 }
 0x2b6   : > { %v1623_v7 = vpop.f32.mrf.mxu0 }
 0x2b7   : > { %v1624_v24 = vadd.f32 %v1623_v7, %v3659_v8 }
 0x2bc   : > { %v1652_v13 = vpop.f32.mrf.mxu1  ;;  %v1681_v15 = vpop.f32.mrf.mxu2 }
 0x2bd   : > { %v1653_v26 = vadd.f32 %v1652_v13, %v1624_v24  ;;  %v1682_v0 = vadd.f32 %v1681_v15, %v3662_v34 }
 0x2be   : > { %v1625_v17 = vpop.f32.mrf.mxu0 }
 0x2bf   : > { %v1626_v27 = vadd.f32 %v1625_v17, %v3659_v8  ;;  %v1730_v59 = vadd.f32 %v1653_v26, %v1050_v29 }
 0x2c1   : > { %v1746_v16 = vmax.f32 %v1730_v59, 0.0 }
 0x2c2   : > { %v1710_v38 = vpop.f32.mrf.mxu3 }
 0x2c3   : > { %v1711_v40 = vadd.f32 %v1710_v38, %v1682_v0 }
 0x2c4   : > { %v1654_v42 = vpop.f32.mrf.mxu1  ;;  %v1683_v22 = vpop.f32.mrf.mxu2 }
 0x2c5   : > { %v1655_v43 = vadd.f32 %v1654_v42, %v1626_v27  ;;  %v1684_v36 = vadd.f32 %v1683_v22, %v3662_v34  ;;  %v1731_v57 = vadd.f32 %v1711_v40, %v1051_v63 }
 0x2c6   : > { %v1628_v4 = vpop.f32.mrf.mxu0 }
 0x2c7   : > { %v1732_v28 = vadd.f32 %v1655_v43, %v1052_v32  ;;  %v1747_v2 = vmax.f32 %v1731_v57, 0.0  ;;  %v1629_v25 = vadd.f32 %v1628_v4, %v3659_v8 }
 0x2c9   : > { %v1748_v53 = vmax.f32 %v1732_v28, 0.0 }
 0x2ca   : > { %v1712_v21 = vpop.f32.mrf.mxu3 }
 0x2cb   : > { %v1762_v60 = vpack.c.bf16 %v1748_v53, %v1746_v16  ;;  %v1713_v20 = vadd.f32 %v1712_v21, %v1684_v36 }
 0x2cc   : > { %v1657_v19 = vpop.f32.mrf.mxu1  ;;  %v1686_v29 = vpop.f32.mrf.mxu2 }
 0x2cd   : > { %v1733_v31 = vadd.f32 %v1713_v20, %v1053_v58  ;;  %1906 = vmatmul.bf16.vlgmr.msra.gmra.mxu0 %v1762_v60  ;;  %v1658_v6 = vadd.f32 %v1657_v19, %v1629_v25  ;;  %v1687_v47 = vadd.f32 %v1686_v29, %v3662_v34 }
 0x2ce   : > { %v1630_v1 = vpop.f32.mrf.mxu0 }
 0x2cf   : > { %v1749_v32 = vmax.f32 %v1733_v31, 0.0  ;;  %v1631_v7 = vadd.f32 %v1630_v1, %v3659_v8  ;;  %v1734_v9 = vadd.f32 %v1658_v6, %v1054_v49 }
 0x2d1   : > { %v1763_v61 = vpack.c.bf16 %v1749_v32, %v1747_v2  ;;  %v1750_v24 = vmax.f32 %v1734_v9, 0.0 }
 0x2d2   : > { %v1715_v62 = vpop.f32.mrf.mxu3 }
 0x2d3   : > { %1935 = vmatmul.bf16.vlgmr.msra.gmra.mxu1 %v1763_v61  ;;  %v1716_v15 = vadd.f32 %v1715_v62, %v1687_v47 }
 0x2d4   : > { %v1659_v35 = vpop.f32.mrf.mxu1  ;;  %v1688_v63 = vpop.f32.mrf.mxu2 }
 0x2d5   : > { %v1660_v58 = vadd.f32 %v1659_v35, %v1631_v7  ;;  %v1689_v38 = vadd.f32 %v1688_v63, %v3662_v34  ;;  %v1735_v42 = vadd.f32 %v1716_v15, %v1055_v56 }
 0x2d6   : > { %v1633_v13 = vpop.f32.mrf.mxu0 }
 0x2d7   : > { %v1736_v17 = vadd.f32 %v1660_v58, %v1056_v50  ;;  %v1751_v4 = vmax.f32 %v1735_v42, 0.0  ;;  %v1634_v45 = vadd.f32 %v1633_v13, %v3659_v8 }
 0x2d9   : > { %v1752_v26 = vmax.f32 %v1736_v17, 0.0 }
 0x2da   : > { %v1717_v27 = vpop.f32.mrf.mxu3 }
 0x2db   : > { %v1718_v22 = vadd.f32 %v1717_v27, %v1689_v38  ;;  %v1764_v59 = vpack.c.bf16 %v1752_v26, %v1750_v24 }
 0x2dc   : > { %v1662_v44 = vpop.f32.mrf.mxu1  ;;  %v1691_v49 = vpop.f32.mrf.mxu2 }
 0x2dd   : > { %v1737_v0 = vadd.f32 %v1718_v22, %v1057_v30  ;;  %1911 = vmatmul.bf16.gmra.mxu0 %v1764_v59  ;;  %v1663_v40 = vadd.f32 %v1662_v44, %v1634_v45  ;;  %v1692_v54 = vadd.f32 %v1691_v49, %v3662_v34 }
 0x2de   : > { %v1635_v43 = vpop.f32.mrf.mxu0 }
 0x2df   : > { %v1753_v50 = vmax.f32 %v1737_v0, 0.0  ;;  %v1636_v53 = vadd.f32 %v1635_v43, %v3659_v8  ;;  %v1738_v36 = vadd.f32 %v1663_v40, %v1058_v48 }
 0x2e1   : > { %v1765_v28 = vpack.c.bf16 %v1753_v50, %v1751_v4  ;;  %v1754_v20 = vmax.f32 %v1738_v36, 0.0 }
 0x2e2   : > { %v1720_v16 = vpop.f32.mrf.mxu3 }
 0x2e3   : > { %1940 = vmatmul.bf16.gmra.mxu1 %v1765_v28  ;;  %v1721_v57 = vadd.f32 %v1720_v16, %v1692_v54 }
 0x2e4   : > { %v1664_v52 = vpop.f32.mrf.mxu1  ;;  %v1693_v56 = vpop.f32.mrf.mxu2 }
 0x2e5   : > { %v1665_v30 = vadd.f32 %v1664_v52, %v1636_v53  ;;  %v1694_v29 = vadd.f32 %v1693_v56, %v3662_v34  ;;  %v1739_v1 = vadd.f32 %v1721_v57, %v1059_v39 }
 0x2e6   : > { %v1638_v21 = vpop.f32.mrf.mxu0 }
 0x2e7   : > { %v1740_v60 = vadd.f32 %v1665_v30, %v1060_v51  ;;  %v1755_v61 = vmax.f32 %v1739_v1, 0.0  ;;  %v1639_v41 = vadd.f32 %v1638_v21, %v3659_v8 }
 0x2e9   : > { %v1756_v19 = vmax.f32 %v1740_v60, 0.0 }
 0x2ea   : > { %v1722_v31 = vpop.f32.mrf.mxu3 }
 0x2eb   : > { %v1723_v2 = vadd.f32 %v1722_v31, %v1694_v29  ;;  %v1766_v25 = vpack.c.bf16 %v1756_v19, %v1754_v20 }
 0x2ec   : > { %v1667_v14 = vpop.f32.mrf.mxu1  ;;  %v1696_v48 = vpop.f32.mrf.mxu2 }
 0x2ed   : > { %v1741_v32 = vadd.f32 %v1723_v2, %v1061_v33  ;;  %1916 = vmatmul.bf16.gmra.mxu0 %v1766_v25  ;;  %v1668_v62 = vadd.f32 %v1667_v14, %v1639_v41  ;;  %v1697_v9 = vadd.f32 %v1696_v48, %v3662_v34 }
 0x2ee   : > { %v1640_v6 = vpop.f32.mrf.mxu0 }
 0x2ef   : > { %v1757_v51 = vmax.f32 %v1741_v32, 0.0  ;;  %v1641_v63 = vadd.f32 %v1640_v6, %v3659_v8  ;;  %v1742_v39 = vadd.f32 %v1668_v62, %v1062_v5 }
 0x2f1   : > { %v1767_v7 = vpack.c.bf16 %v1757_v51, %v1755_v61  ;;  %v1758_v13 = vmax.f32 %v1742_v39, 0.0 }
 0x2f2   : > { %v1725_v35 = vpop.f32.mrf.mxu3 }
 0x2f3   : > { %1945 = vmatmul.bf16.gmra.mxu1 %v1767_v7  ;;  %v1726_v47 = vadd.f32 %v1725_v35, %v1697_v9 }
 0x2f4   : > { %v1669_v55 = vpop.f32.mrf.mxu1  ;;  %v1698_v33 = vpop.f32.mrf.mxu2 }
 0x2f5   : > { %v1670_v23 = vadd.f32 %v1669_v55, %v1641_v63  ;;  %v1699_v17 = vadd.f32 %v1698_v33, %v3662_v34  ;;  %v1743_v8 = vadd.f32 %v1726_v47, %v1063_v12 }
 0x2f7   : > { %v1744_v58 = vadd.f32 %v1670_v23, %v1064_v10  ;;  %v1759_v38 = vmax.f32 %v1743_v8, 0.0 }
 0x2f9   : > { %v1760_v15 = vmax.f32 %v1744_v58, 0.0 }
 0x2fa   : > { %v1727_v24 = vpop.f32.mrf.mxu3 }
 0x2fb   : > { %v1728_v26 = vadd.f32 %v1727_v24, %v1699_v17  ;;  %v1768_v3 = vpack.c.bf16 %v1760_v15, %v1758_v13 }
 0x2fd   : > { %v1745_v5 = vadd.f32 %v1728_v26, %v1065_v37  ;;  %1921 = vmatmul.bf16.gmra.mxu0 %v1768_v3 }
 0x2ff   : > { %v1761_v27 = vmax.f32 %v1745_v5, 0.0 }
 0x301   : > { %v1769_v42 = vpack.c.bf16 %v1761_v27, %v1759_v38 }
 0x303   : > { %1950 = vmatmul.bf16.gmra.mxu1 %v1769_v42 }
 0x34a   : > { %v1907_v11 = vpop.f32.mrf.mxu0 }
 0x350   : > { %v1936_v10 = vpop.f32.mrf.mxu1 }
 0x351   : > { %v1937_v22 = vadd.f32 %v1936_v10, %v1907_v11 }
 0x352   : > { %v1909_v59 = vpop.f32.mrf.mxu0 }
 0x353   : > { %1956 = vst [vmem:[%s3712_s11] sm:$0xff] %v1937_v22 }
 0x358   : > { %v1938_v18 = vpop.f32.mrf.mxu1 }
 0x359   : > { %v1939_v46 = vadd.f32 %v1938_v18, %v1909_v59 }
 0x35a   : > { %v1912_v12 = vpop.f32.mrf.mxu0 }
 0x35b   : > { %1957 = vst [vmem:[%s3712_s11 + $0x8] sm:$0xff] %v1939_v46 }
 0x360   : > { %v1941_v37 = vpop.f32.mrf.mxu1 }
 0x361   : > { %v1942_v34 = vadd.f32 %v1941_v37, %v1912_v12 }
 0x362   : > { %v1914_v44 = vpop.f32.mrf.mxu0 }
 0x363   : > { %1958 = vst [vmem:[%s3712_s11 + $0x10] sm:$0xff] %v1942_v34 }
 0x368   : > { %v1943_v49 = vpop.f32.mrf.mxu1 }
 0x369   : > { %v1944_v0 = vadd.f32 %v1943_v49, %v1914_v44 }
 0x36a   : > { %v1917_v43 = vpop.f32.mrf.mxu0 }
 0x36b   : > { %1959 = vst [vmem:[%s3712_s11 + $0x18] sm:$0xff] %v1944_v0 }
 0x370   : > { %v1946_v4 = vpop.f32.mrf.mxu1 }
 0x371   : > { %v1947_v45 = vadd.f32 %v1946_v4, %v1917_v43 }
 0x372   : > { %v1919_v50 = vpop.f32.mrf.mxu0 }
 0x373   : > { %1960 = vst [vmem:[%s3712_s11 + $0x20] sm:$0xff] %v1947_v45 }
 0x378   : > { %v1948_v40 = vpop.f32.mrf.mxu1 }
 0x379   : > { %v1949_v28 = vadd.f32 %v1948_v40, %v1919_v50 }
 0x37a   : > { %v1922_v16 = vpop.f32.mrf.mxu0 }
 0x37b   : > { %1961 = vst [vmem:[%s3712_s11 + $0x28] sm:$0xff] %v1949_v28 }
 0x380   : > { %v1951_v53 = vpop.f32.mrf.mxu1 }
 0x381   : > { %v1952_v52 = vadd.f32 %v1951_v53, %v1922_v16 }
 0x382   : > { %v1924_v56 = vpop.f32.mrf.mxu0 }
 0x383   : > { %1962 = vst [vmem:[%s3712_s11 + $0x30] sm:$0xff] %v1952_v52 }
 0x388   : > { %v1953_v36 = vpop.f32.mrf.mxu1 }
 0x389   : > { %v1954_v54 = vadd.f32 %v1953_v36, %v1924_v56 }
 0x38b   : > { %1963 = vst [vmem:[%s3712_s11 + $0x38] sm:$0xff] %v1954_v54 }
 0x38c   : > { %3187 = shalt.err (!%p3184_p9)
}
 0x38d   : > { %s3253_s16 = smov 128   ;;  %s3254_s29 = smov 8  }
 0x38e   : > { %2887 = dma.vmem_to_hbm [thread:$0]  (%p3380_p0), %s1978_s7, 1024, %s1980_s12, %s1965_s13, %s3253_s16, %s3253_s16, %s3254_s29  }
 0x38f PF: > { %s1994_s11 = sand.u32 1, %s3226_s21   ;;  %p3772_p10 = scmp.ge.s32.totalorder %s3238_s24, 2 }
 0x390   : > { %s1995_s15 = scalar_lea.sflag [#allocation4], %s1994_s11 }
 0x391   : > { %p2910_p11 = pnand %p3772_p10, %p3386_p6 }
 0x393   : > { %p2911_p12 = pneg %p2910_p11 }
 0x395   : > { %3221 = dma.done.wait (%p2911_p12), %s1995_s15, 1024  }
 0x396   : > { %3223 = vsyncadd (%p2911_p12), %s1995_s15, 4294966272  ;;  %p22_p2 = scmp.ge.s32.totalorder %s3356_s19, 4   ;;  %s3773_s21 = smov %s3230_s22 }
 0x397   : > { %s3774_s22 = smov %s3234_s23  ;;  %s3775_s23 = smov %s3368_s26 }
 0x398   : > { %s3776_s24 = smov %s3356_s19  ;;  %24 = sbr.rel (!%p22_p2) target bundleno = 10 (0xa), region = 113 }
 0x39d   :  { %2001 = vsyncpa [#allocation3], 1 }
 0x39e   :  { %2003 = vsyncpa [#allocation3 + $0x1], 1 }
 0x39f   :  { %2004 = vsyncpa [#allocation6], 1 }
 0x3a0   :  { %2005 = vsyncpa [#allocation9], 1 }
 0x3a1   :  { %2006 = vsyncpa [#allocation12], 1 }
 0x3a2   :  { %2007 = vsyncpa [#allocation4], 1 }
 0x3a3   :  { %2009 = vsyncpa [#allocation4 + $0x1], 1 }

</bundles_post_ra>
